<compile_context>
chip_gen: v5e
topology: v5e:2x2
jax: 0.10.0
libtpu: 0.0.40
codegen_flags: <defaults>
</compile_context>

<pallas_src>
import functools

import jax
import jax.numpy as jnp
from jax import lax
from jax.experimental import pallas as pl
from jax.experimental.pallas import tpu as pltpu

N_IN, N_HID, N_OUT = 2, 10, 2
_SLOPE = 0.2

LANES = 128                      # lane width of a vreg
SUBS = 8                         # sublanes per f32 vreg
ELEMS_PER_ROW = LANES // N_IN    # 64 batch elements per natural-layout row
ROWS_PER_CHUNK = 2 * SUBS        # 16 rows = two vregs = one dense compute chunk
CHUNK = ROWS_PER_CHUNK * ELEMS_PER_ROW   # 1024 batch elements per inner chunk


def _leaky_relu(a):
    # For slope in (0,1): leaky_relu(a) == max(a, slope*a) -> single VPU max.
    return jnp.maximum(a, jnp.float32(_SLOPE) * a)


def classifier_kernel(x_ref, w1_ref, b1_ref, w2_ref, b2_ref, w3_ref, b3_ref,
                      out_ref):
    """Natural-layout blocks.

    x_ref/out_ref : (tile_rows, 128) VMEM. Row r, lane l holds feature (l % 2)
                    of batch element r*64 + l//2 (free reshape of the
                    row-major (B, 2) array).
    w*/b*         : flat f32 1-D arrays in SMEM; weights row-major (in, out).
    """
    tile_rows = x_ref.shape[0]
    n_chunks = tile_rows // ROWS_PER_CHUNK

    # Hoist all scalar parameter reads out of the batch loop (loop invariant).
    # NOTE(perf audit): ~150 scalars won't all stay resident in sregs; if a
    # bundle dump shows the scalar (sld) slots co-binding with the VALU,
    # stream w2 column-by-column so only ~12 scalars are live at once.
    w1 = [[w1_ref[k * N_HID + j] for j in range(N_HID)] for k in range(N_IN)]
    b1 = [b1_ref[j] for j in range(N_HID)]
    w2 = [[w2_ref[k * N_HID + j] for j in range(N_HID)] for k in range(N_HID)]
    b2 = [b2_ref[j] for j in range(N_HID)]
    # Layer-3 folded to the logit *difference* column (scalar slots have slack):
    #   d = logit1 - logit0 = sum_k h2[k]*(w3[k,1]-w3[k,0]) + (b3[1]-b3[0])
    wd = [w3_ref[k * N_OUT + 1] - w3_ref[k * N_OUT + 0] for k in range(N_HID)]
    bd = b3_ref[1] - b3_ref[0]

    # Lane-parity mask (hoisted): even lanes <-> feature 0, odd <-> feature 1.
    lane = lax.broadcasted_iota(jnp.int32, (SUBS, LANES), 1)
    even = (lane & 1) == 0

    def process_chunk(c, carry):
        base = pl.multiple_of(c * ROWS_PER_CHUNK, ROWS_PER_CHUNK)
        base_b = pl.multiple_of(base + SUBS, SUBS)
        va = x_ref[pl.ds(base, SUBS), :]     # 512 elems (half A), interleaved
        vb = x_ref[pl.ds(base_b, SUBS), :]   # 512 elems (half B), interleaved

        # In-kernel de-interleave: rolls go to the otherwise-idle XLU; only the
        # two selects touch the binding VALU slot.
        ra = pltpu.roll(va, shift=LANES - 1, axis=1)   # lane l <- va[l+1]
        rb = pltpu.roll(vb, shift=1, axis=1)           # lane l <- vb[l-1]
        x0 = jnp.where(even, va, rb)   # dense feature-0 vreg (1024 elements)
        x1 = jnp.where(even, ra, vb)   # dense feature-1 vreg

        # Linear(2,10) + LeakyReLU: unrolled broadcast FMAs on the VPU.
        h1 = [_leaky_relu(x0 * w1[0][j] + x1 * w1[1][j] + b1[j])
              for j in range(N_HID)]

        # Linear(10,10) + LeakyReLU
        h2 = []
        for j in range(N_HID):
            a = h1[0] * w2[0][j] + b2[j]
            for k in range(1, N_HID):
                a = a + h1[k] * w2[k][j]
            h2.append(_leaky_relu(a))

        # Folded Linear(10,2): only the logit difference feeds the softmax.
        d = h2[0] * wd[0] + bd
        for k in range(1, N_HID):
            d = d + h2[k] * wd[k]

        # 2-class softmax == sigmoid pair; p1 = 1 - p0 saves an exp + divide.
        # exp overflow -> inf -> 1/(1+inf) = 0, so this is stable without
        # max-subtraction and matches softmax to rounding.
        p0 = 1.0 / (1.0 + jnp.exp(d))
        p1 = 1.0 - p0

        # Re-interleave back to the natural (B, 2) layout (lane-dense stores).
        out_ref[pl.ds(base, SUBS), :] = jnp.where(
            even, p0, pltpu.roll(p1, shift=1, axis=1))
        out_ref[pl.ds(base_b, SUBS), :] = jnp.where(
            even, pltpu.roll(p0, shift=LANES - 1, axis=1), p1)
        return carry

    # unroll=2 gives cross-chunk overlap while bounding vreg pressure.
    lax.fori_loop(0, n_chunks, process_chunk, 0, unroll=min(2, n_chunks))


@functools.partial(jax.jit, static_argnums=(2,))
def _classifier_forward_jit(x, params, tile_batch):
    B = int(x.shape[0])

    flat = lambda a: jnp.asarray(a, jnp.float32).reshape(-1)
    w1, b1 = flat(params["w1"]), flat(params["b1"])
    w2, b2 = flat(params["w2"]), flat(params["b2"])
    w3, b3 = flat(params["w3"]), flat(params["b3"])

    # Batch tiling in whole 1024-element chunks. Guarantee >= 2 grid steps
    # when possible so the "parallel" axis can shard across both v7x cores.
    chunks_total = -(-B // CHUNK)
    chunks_per_tile = max(1, tile_batch // CHUNK)
    if chunks_total >= 2:
        chunks_per_tile = min(chunks_per_tile, (chunks_total + 1) // 2)
    chunks_per_tile = min(chunks_per_tile, chunks_total)
    num_tiles = -(-chunks_total // chunks_per_tile)
    b_pad = num_tiles * chunks_per_tile * CHUNK
    tile_rows = chunks_per_tile * ROWS_PER_CHUNK

    xf = jnp.asarray(x, jnp.float32)
    if b_pad != B:
        # Only a pad (no transpose) pass remains; for large ragged batches a
        # masked-store tail inside the kernel could remove this copy too.
        xf = jnp.pad(xf, ((0, b_pad - B), (0, 0)))

    # Free (contiguous, row-major) reshape: each row holds 64 batch elements
    # with the 2 features interleaved on lane parity. No data movement.
    x2 = xf.reshape(b_pad // ELEMS_PER_ROW, LANES)

    smem = lambda: pl.BlockSpec(memory_space=pltpu.MemorySpace.SMEM)

    out2 = pl.pallas_call(
        classifier_kernel,
        out_shape=jax.ShapeDtypeStruct((b_pad // ELEMS_PER_ROW, LANES),
                                       jnp.float32),
        grid=(num_tiles,),
        in_specs=[
            pl.BlockSpec((tile_rows, LANES), lambda i: (i, 0)),
            smem(), smem(), smem(), smem(), smem(), smem(),
        ],
        out_specs=pl.BlockSpec((tile_rows, LANES), lambda i: (i, 0)),
        compiler_params=pltpu.CompilerParams(
            dimension_semantics=("parallel",),
        ),
    )(x2, w1, b1, w2, b2, w3, b3)

    # Free reshape back to the natural (B, 2) layout; slice off padding.
    out = out2.reshape(b_pad, N_OUT)
    return out[:B]


def classifier_forward(x, params, *, tile_batch=256 * 1024):
    """x: (B, 2) float. params: w1 (2,10), b1 (10,), w2 (10,10), b2 (10,),
    w3 (10,2), b3 (2,). Weights stored as (in, out) so y = x @ W + b,
    matching PyTorch's y = x @ weight.T + bias."""
    return _classifier_forward_jit(x, params, int(tile_batch))


def init_params(key):
    """Mimics PyTorch's default Linear init U(-1/sqrt(fan_in), 1/sqrt(fan_in)).
    Weights stored as (in, out); biases as (out,)."""
    def linear(key, fan_in, fan_out):
        kw, kb = jax.random.split(key)
        bound = 1.0 / (fan_in ** 0.5)
        w = jax.random.uniform(kw, (fan_in, fan_out), jnp.float32, -bound, bound)
        b = jax.random.uniform(kb, (fan_out,), jnp.float32, -bound, bound)
        return w, b

    k1, k2, k3 = jax.random.split(key, 3)
    w1, b1 = linear(k1, 2, 10)
    w2, b2 = linear(k2, 10, 10)
    w3, b3 = linear(k3, 10, 2)
    return dict(w1=w1, b1=b1, w2=w2, b2=b2, w3=w3, b3=b3)


def reference_forward(x, params):
    hp = jax.lax.Precision.HIGHEST  # full-f32 matmuls for a tight comparison
    lrelu = lambda a: jnp.where(a >= 0, a, _SLOPE * a)
    h1 = lrelu(jnp.dot(x, params["w1"], precision=hp) + params["b1"])
    h2 = lrelu(jnp.dot(h1, params["w2"], precision=hp) + params["b2"])
    logits = jnp.dot(h2, params["w3"], precision=hp) + params["b3"]
    return jax.nn.softmax(logits, axis=1)


if __name__ == "__main__":
    key = jax.random.PRNGKey(0)
    kx, kp = jax.random.split(key)

    B = 8
    x = jax.random.normal(kx, (B, 2), dtype=jnp.float32)
    params = init_params(kp)

    out = classifier_forward(x, params)
    out = jax.block_until_ready(out)

    ref = reference_forward(x, params)
    assert out.shape == (B, N_OUT)
    assert jnp.allclose(out, ref, atol=1e-5, rtol=1e-4), (out, ref)
    # rows of a softmax sum to 1
    assert jnp.allclose(jnp.sum(out, axis=1), jnp.ones((B,)), atol=1e-5)

    print("KERNEL_OK")
</pallas_src>

<mosaic_0001>
module attributes {stable_mosaic.version = 11 : i64} {
  func.func @classifier_kernel(%arg0: i32, %arg1: memref<16x128xf32, #tpu.memory_space<vmem>>, %arg2: memref<20xf32, #tpu.memory_space<smem>>, %arg3: memref<10xf32, #tpu.memory_space<smem>>, %arg4: memref<100xf32, #tpu.memory_space<smem>>, %arg5: memref<10xf32, #tpu.memory_space<smem>>, %arg6: memref<20xf32, #tpu.memory_space<smem>>, %arg7: memref<2xf32, #tpu.memory_space<smem>>, %arg8: memref<16x128xf32, #tpu.memory_space<vmem>>) attributes {dimension_semantics = [#tpu.dimension_semantics<parallel>], iteration_bounds = array<i64: 1>, scalar_prefetch = 0 : i64, scratch_operands = 0 : i64, tpu.core_type = #tpu.core_type<tc>, window_params = [{transform_indices = @transform_0, window_bounds = array<i64: 16, 128>}, {transform_indices = @transform_1, window_bounds = array<i64: 20>}, {transform_indices = @transform_2, window_bounds = array<i64: 10>}, {transform_indices = @transform_3, window_bounds = array<i64: 100>}, {transform_indices = @transform_4, window_bounds = array<i64: 10>}, {transform_indices = @transform_5, window_bounds = array<i64: 20>}, {transform_indices = @transform_6, window_bounds = array<i64: 2>}, {transform_indices = @transform_7, window_bounds = array<i64: 16, 128>}]} {
    %c0 = arith.constant 0 : index
    %0 = memref.load %arg2[%c0] : memref<20xf32, #tpu.memory_space<smem>>
    %c1 = arith.constant 1 : index
    %1 = memref.load %arg2[%c1] : memref<20xf32, #tpu.memory_space<smem>>
    %c2 = arith.constant 2 : index
    %2 = memref.load %arg2[%c2] : memref<20xf32, #tpu.memory_space<smem>>
    %c3 = arith.constant 3 : index
    %3 = memref.load %arg2[%c3] : memref<20xf32, #tpu.memory_space<smem>>
    %c4 = arith.constant 4 : index
    %4 = memref.load %arg2[%c4] : memref<20xf32, #tpu.memory_space<smem>>
    %c5 = arith.constant 5 : index
    %5 = memref.load %arg2[%c5] : memref<20xf32, #tpu.memory_space<smem>>
    %c6 = arith.constant 6 : index
    %6 = memref.load %arg2[%c6] : memref<20xf32, #tpu.memory_space<smem>>
    %c7 = arith.constant 7 : index
    %7 = memref.load %arg2[%c7] : memref<20xf32, #tpu.memory_space<smem>>
    %c8 = arith.constant 8 : index
    %8 = memref.load %arg2[%c8] : memref<20xf32, #tpu.memory_space<smem>>
    %c9 = arith.constant 9 : index
    %9 = memref.load %arg2[%c9] : memref<20xf32, #tpu.memory_space<smem>>
    %c10 = arith.constant 10 : index
    %10 = memref.load %arg2[%c10] : memref<20xf32, #tpu.memory_space<smem>>
    %c11 = arith.constant 11 : index
    %11 = memref.load %arg2[%c11] : memref<20xf32, #tpu.memory_space<smem>>
    %c12 = arith.constant 12 : index
    %12 = memref.load %arg2[%c12] : memref<20xf32, #tpu.memory_space<smem>>
    %c13 = arith.constant 13 : index
    %13 = memref.load %arg2[%c13] : memref<20xf32, #tpu.memory_space<smem>>
    %c14 = arith.constant 14 : index
    %14 = memref.load %arg2[%c14] : memref<20xf32, #tpu.memory_space<smem>>
    %c15 = arith.constant 15 : index
    %15 = memref.load %arg2[%c15] : memref<20xf32, #tpu.memory_space<smem>>
    %c16 = arith.constant 16 : index
    %16 = memref.load %arg2[%c16] : memref<20xf32, #tpu.memory_space<smem>>
    %c17 = arith.constant 17 : index
    %17 = memref.load %arg2[%c17] : memref<20xf32, #tpu.memory_space<smem>>
    %c18 = arith.constant 18 : index
    %18 = memref.load %arg2[%c18] : memref<20xf32, #tpu.memory_space<smem>>
    %c19 = arith.constant 19 : index
    %19 = memref.load %arg2[%c19] : memref<20xf32, #tpu.memory_space<smem>>
    %c0_0 = arith.constant 0 : index
    %20 = memref.load %arg3[%c0_0] : memref<10xf32, #tpu.memory_space<smem>>
    %c1_1 = arith.constant 1 : index
    %21 = memref.load %arg3[%c1_1] : memref<10xf32, #tpu.memory_space<smem>>
    %c2_2 = arith.constant 2 : index
    %22 = memref.load %arg3[%c2_2] : memref<10xf32, #tpu.memory_space<smem>>
    %c3_3 = arith.constant 3 : index
    %23 = memref.load %arg3[%c3_3] : memref<10xf32, #tpu.memory_space<smem>>
    %c4_4 = arith.constant 4 : index
    %24 = memref.load %arg3[%c4_4] : memref<10xf32, #tpu.memory_space<smem>>
    %c5_5 = arith.constant 5 : index
    %25 = memref.load %arg3[%c5_5] : memref<10xf32, #tpu.memory_space<smem>>
    %c6_6 = arith.constant 6 : index
    %26 = memref.load %arg3[%c6_6] : memref<10xf32, #tpu.memory_space<smem>>
    %c7_7 = arith.constant 7 : index
    %27 = memref.load %arg3[%c7_7] : memref<10xf32, #tpu.memory_space<smem>>
    %c8_8 = arith.constant 8 : index
    %28 = memref.load %arg3[%c8_8] : memref<10xf32, #tpu.memory_space<smem>>
    %c9_9 = arith.constant 9 : index
    %29 = memref.load %arg3[%c9_9] : memref<10xf32, #tpu.memory_space<smem>>
    %c0_10 = arith.constant 0 : index
    %30 = memref.load %arg4[%c0_10] : memref<100xf32, #tpu.memory_space<smem>>
    %c1_11 = arith.constant 1 : index
    %31 = memref.load %arg4[%c1_11] : memref<100xf32, #tpu.memory_space<smem>>
    %c2_12 = arith.constant 2 : index
    %32 = memref.load %arg4[%c2_12] : memref<100xf32, #tpu.memory_space<smem>>
    %c3_13 = arith.constant 3 : index
    %33 = memref.load %arg4[%c3_13] : memref<100xf32, #tpu.memory_space<smem>>
    %c4_14 = arith.constant 4 : index
    %34 = memref.load %arg4[%c4_14] : memref<100xf32, #tpu.memory_space<smem>>
    %c5_15 = arith.constant 5 : index
    %35 = memref.load %arg4[%c5_15] : memref<100xf32, #tpu.memory_space<smem>>
    %c6_16 = arith.constant 6 : index
    %36 = memref.load %arg4[%c6_16] : memref<100xf32, #tpu.memory_space<smem>>
    %c7_17 = arith.constant 7 : index
    %37 = memref.load %arg4[%c7_17] : memref<100xf32, #tpu.memory_space<smem>>
    %c8_18 = arith.constant 8 : index
    %38 = memref.load %arg4[%c8_18] : memref<100xf32, #tpu.memory_space<smem>>
    %c9_19 = arith.constant 9 : index
    %39 = memref.load %arg4[%c9_19] : memref<100xf32, #tpu.memory_space<smem>>
    %c10_20 = arith.constant 10 : index
    %40 = memref.load %arg4[%c10_20] : memref<100xf32, #tpu.memory_space<smem>>
    %c11_21 = arith.constant 11 : index
    %41 = memref.load %arg4[%c11_21] : memref<100xf32, #tpu.memory_space<smem>>
    %c12_22 = arith.constant 12 : index
    %42 = memref.load %arg4[%c12_22] : memref<100xf32, #tpu.memory_space<smem>>
    %c13_23 = arith.constant 13 : index
    %43 = memref.load %arg4[%c13_23] : memref<100xf32, #tpu.memory_space<smem>>
    %c14_24 = arith.constant 14 : index
    %44 = memref.load %arg4[%c14_24] : memref<100xf32, #tpu.memory_space<smem>>
    %c15_25 = arith.constant 15 : index
    %45 = memref.load %arg4[%c15_25] : memref<100xf32, #tpu.memory_space<smem>>
    %c16_26 = arith.constant 16 : index
    %46 = memref.load %arg4[%c16_26] : memref<100xf32, #tpu.memory_space<smem>>
    %c17_27 = arith.constant 17 : index
    %47 = memref.load %arg4[%c17_27] : memref<100xf32, #tpu.memory_space<smem>>
    %c18_28 = arith.constant 18 : index
    %48 = memref.load %arg4[%c18_28] : memref<100xf32, #tpu.memory_space<smem>>
    %c19_29 = arith.constant 19 : index
    %49 = memref.load %arg4[%c19_29] : memref<100xf32, #tpu.memory_space<smem>>
    %c20 = arith.constant 20 : index
    %50 = memref.load %arg4[%c20] : memref<100xf32, #tpu.memory_space<smem>>
    %c21 = arith.constant 21 : index
    %51 = memref.load %arg4[%c21] : memref<100xf32, #tpu.memory_space<smem>>
    %c22 = arith.constant 22 : index
    %52 = memref.load %arg4[%c22] : memref<100xf32, #tpu.memory_space<smem>>
    %c23 = arith.constant 23 : index
    %53 = memref.load %arg4[%c23] : memref<100xf32, #tpu.memory_space<smem>>
    %c24 = arith.constant 24 : index
    %54 = memref.load %arg4[%c24] : memref<100xf32, #tpu.memory_space<smem>>
    %c25 = arith.constant 25 : index
    %55 = memref.load %arg4[%c25] : memref<100xf32, #tpu.memory_space<smem>>
    %c26 = arith.constant 26 : index
    %56 = memref.load %arg4[%c26] : memref<100xf32, #tpu.memory_space<smem>>
    %c27 = arith.constant 27 : index
    %57 = memref.load %arg4[%c27] : memref<100xf32, #tpu.memory_space<smem>>
    %c28 = arith.constant 28 : index
    %58 = memref.load %arg4[%c28] : memref<100xf32, #tpu.memory_space<smem>>
    %c29 = arith.constant 29 : index
    %59 = memref.load %arg4[%c29] : memref<100xf32, #tpu.memory_space<smem>>
    %c30 = arith.constant 30 : index
    %60 = memref.load %arg4[%c30] : memref<100xf32, #tpu.memory_space<smem>>
    %c31 = arith.constant 31 : index
    %61 = memref.load %arg4[%c31] : memref<100xf32, #tpu.memory_space<smem>>
    %c32 = arith.constant 32 : index
    %62 = memref.load %arg4[%c32] : memref<100xf32, #tpu.memory_space<smem>>
    %c33 = arith.constant 33 : index
    %63 = memref.load %arg4[%c33] : memref<100xf32, #tpu.memory_space<smem>>
    %c34 = arith.constant 34 : index
    %64 = memref.load %arg4[%c34] : memref<100xf32, #tpu.memory_space<smem>>
    %c35 = arith.constant 35 : index
    %65 = memref.load %arg4[%c35] : memref<100xf32, #tpu.memory_space<smem>>
    %c36 = arith.constant 36 : index
    %66 = memref.load %arg4[%c36] : memref<100xf32, #tpu.memory_space<smem>>
    %c37 = arith.constant 37 : index
    %67 = memref.load %arg4[%c37] : memref<100xf32, #tpu.memory_space<smem>>
    %c38 = arith.constant 38 : index
    %68 = memref.load %arg4[%c38] : memref<100xf32, #tpu.memory_space<smem>>
    %c39 = arith.constant 39 : index
    %69 = memref.load %arg4[%c39] : memref<100xf32, #tpu.memory_space<smem>>
    %c40 = arith.constant 40 : index
    %70 = memref.load %arg4[%c40] : memref<100xf32, #tpu.memory_space<smem>>
    %c41 = arith.constant 41 : index
    %71 = memref.load %arg4[%c41] : memref<100xf32, #tpu.memory_space<smem>>
    %c42 = arith.constant 42 : index
    %72 = memref.load %arg4[%c42] : memref<100xf32, #tpu.memory_space<smem>>
    %c43 = arith.constant 43 : index
    %73 = memref.load %arg4[%c43] : memref<100xf32, #tpu.memory_space<smem>>
    %c44 = arith.constant 44 : index
    %74 = memref.load %arg4[%c44] : memref<100xf32, #tpu.memory_space<smem>>
    %c45 = arith.constant 45 : index
    %75 = memref.load %arg4[%c45] : memref<100xf32, #tpu.memory_space<smem>>
    %c46 = arith.constant 46 : index
    %76 = memref.load %arg4[%c46] : memref<100xf32, #tpu.memory_space<smem>>
    %c47 = arith.constant 47 : index
    %77 = memref.load %arg4[%c47] : memref<100xf32, #tpu.memory_space<smem>>
    %c48 = arith.constant 48 : index
    %78 = memref.load %arg4[%c48] : memref<100xf32, #tpu.memory_space<smem>>
    %c49 = arith.constant 49 : index
    %79 = memref.load %arg4[%c49] : memref<100xf32, #tpu.memory_space<smem>>
    %c50 = arith.constant 50 : index
    %80 = memref.load %arg4[%c50] : memref<100xf32, #tpu.memory_space<smem>>
    %c51 = arith.constant 51 : index
    %81 = memref.load %arg4[%c51] : memref<100xf32, #tpu.memory_space<smem>>
    %c52 = arith.constant 52 : index
    %82 = memref.load %arg4[%c52] : memref<100xf32, #tpu.memory_space<smem>>
    %c53 = arith.constant 53 : index
    %83 = memref.load %arg4[%c53] : memref<100xf32, #tpu.memory_space<smem>>
    %c54 = arith.constant 54 : index
    %84 = memref.load %arg4[%c54] : memref<100xf32, #tpu.memory_space<smem>>
    %c55 = arith.constant 55 : index
    %85 = memref.load %arg4[%c55] : memref<100xf32, #tpu.memory_space<smem>>
    %c56 = arith.constant 56 : index
    %86 = memref.load %arg4[%c56] : memref<100xf32, #tpu.memory_space<smem>>
    %c57 = arith.constant 57 : index
    %87 = memref.load %arg4[%c57] : memref<100xf32, #tpu.memory_space<smem>>
    %c58 = arith.constant 58 : index
    %88 = memref.load %arg4[%c58] : memref<100xf32, #tpu.memory_space<smem>>
    %c59 = arith.constant 59 : index
    %89 = memref.load %arg4[%c59] : memref<100xf32, #tpu.memory_space<smem>>
    %c60 = arith.constant 60 : index
    %90 = memref.load %arg4[%c60] : memref<100xf32, #tpu.memory_space<smem>>
    %c61 = arith.constant 61 : index
    %91 = memref.load %arg4[%c61] : memref<100xf32, #tpu.memory_space<smem>>
    %c62 = arith.constant 62 : index
    %92 = memref.load %arg4[%c62] : memref<100xf32, #tpu.memory_space<smem>>
    %c63 = arith.constant 63 : index
    %93 = memref.load %arg4[%c63] : memref<100xf32, #tpu.memory_space<smem>>
    %c64 = arith.constant 64 : index
    %94 = memref.load %arg4[%c64] : memref<100xf32, #tpu.memory_space<smem>>
    %c65 = arith.constant 65 : index
    %95 = memref.load %arg4[%c65] : memref<100xf32, #tpu.memory_space<smem>>
    %c66 = arith.constant 66 : index
    %96 = memref.load %arg4[%c66] : memref<100xf32, #tpu.memory_space<smem>>
    %c67 = arith.constant 67 : index
    %97 = memref.load %arg4[%c67] : memref<100xf32, #tpu.memory_space<smem>>
    %c68 = arith.constant 68 : index
    %98 = memref.load %arg4[%c68] : memref<100xf32, #tpu.memory_space<smem>>
    %c69 = arith.constant 69 : index
    %99 = memref.load %arg4[%c69] : memref<100xf32, #tpu.memory_space<smem>>
    %c70 = arith.constant 70 : index
    %100 = memref.load %arg4[%c70] : memref<100xf32, #tpu.memory_space<smem>>
    %c71 = arith.constant 71 : index
    %101 = memref.load %arg4[%c71] : memref<100xf32, #tpu.memory_space<smem>>
    %c72 = arith.constant 72 : index
    %102 = memref.load %arg4[%c72] : memref<100xf32, #tpu.memory_space<smem>>
    %c73 = arith.constant 73 : index
    %103 = memref.load %arg4[%c73] : memref<100xf32, #tpu.memory_space<smem>>
    %c74 = arith.constant 74 : index
    %104 = memref.load %arg4[%c74] : memref<100xf32, #tpu.memory_space<smem>>
    %c75 = arith.constant 75 : index
    %105 = memref.load %arg4[%c75] : memref<100xf32, #tpu.memory_space<smem>>
    %c76 = arith.constant 76 : index
    %106 = memref.load %arg4[%c76] : memref<100xf32, #tpu.memory_space<smem>>
    %c77 = arith.constant 77 : index
    %107 = memref.load %arg4[%c77] : memref<100xf32, #tpu.memory_space<smem>>
    %c78 = arith.constant 78 : index
    %108 = memref.load %arg4[%c78] : memref<100xf32, #tpu.memory_space<smem>>
    %c79 = arith.constant 79 : index
    %109 = memref.load %arg4[%c79] : memref<100xf32, #tpu.memory_space<smem>>
    %c80 = arith.constant 80 : index
    %110 = memref.load %arg4[%c80] : memref<100xf32, #tpu.memory_space<smem>>
    %c81 = arith.constant 81 : index
    %111 = memref.load %arg4[%c81] : memref<100xf32, #tpu.memory_space<smem>>
    %c82 = arith.constant 82 : index
    %112 = memref.load %arg4[%c82] : memref<100xf32, #tpu.memory_space<smem>>
    %c83 = arith.constant 83 : index
    %113 = memref.load %arg4[%c83] : memref<100xf32, #tpu.memory_space<smem>>
    %c84 = arith.constant 84 : index
    %114 = memref.load %arg4[%c84] : memref<100xf32, #tpu.memory_space<smem>>
    %c85 = arith.constant 85 : index
    %115 = memref.load %arg4[%c85] : memref<100xf32, #tpu.memory_space<smem>>
    %c86 = arith.constant 86 : index
    %116 = memref.load %arg4[%c86] : memref<100xf32, #tpu.memory_space<smem>>
    %c87 = arith.constant 87 : index
    %117 = memref.load %arg4[%c87] : memref<100xf32, #tpu.memory_space<smem>>
    %c88 = arith.constant 88 : index
    %118 = memref.load %arg4[%c88] : memref<100xf32, #tpu.memory_space<smem>>
    %c89 = arith.constant 89 : index
    %119 = memref.load %arg4[%c89] : memref<100xf32, #tpu.memory_space<smem>>
    %c90 = arith.constant 90 : index
    %120 = memref.load %arg4[%c90] : memref<100xf32, #tpu.memory_space<smem>>
    %c91 = arith.constant 91 : index
    %121 = memref.load %arg4[%c91] : memref<100xf32, #tpu.memory_space<smem>>
    %c92 = arith.constant 92 : index
    %122 = memref.load %arg4[%c92] : memref<100xf32, #tpu.memory_space<smem>>
    %c93 = arith.constant 93 : index
    %123 = memref.load %arg4[%c93] : memref<100xf32, #tpu.memory_space<smem>>
    %c94 = arith.constant 94 : index
    %124 = memref.load %arg4[%c94] : memref<100xf32, #tpu.memory_space<smem>>
    %c95 = arith.constant 95 : index
    %125 = memref.load %arg4[%c95] : memref<100xf32, #tpu.memory_space<smem>>
    %c96 = arith.constant 96 : index
    %126 = memref.load %arg4[%c96] : memref<100xf32, #tpu.memory_space<smem>>
    %c97 = arith.constant 97 : index
    %127 = memref.load %arg4[%c97] : memref<100xf32, #tpu.memory_space<smem>>
    %c98 = arith.constant 98 : index
    %128 = memref.load %arg4[%c98] : memref<100xf32, #tpu.memory_space<smem>>
    %c99 = arith.constant 99 : index
    %129 = memref.load %arg4[%c99] : memref<100xf32, #tpu.memory_space<smem>>
    %c0_30 = arith.constant 0 : index
    %130 = memref.load %arg5[%c0_30] : memref<10xf32, #tpu.memory_space<smem>>
    %c1_31 = arith.constant 1 : index
    %131 = memref.load %arg5[%c1_31] : memref<10xf32, #tpu.memory_space<smem>>
    %c2_32 = arith.constant 2 : index
    %132 = memref.load %arg5[%c2_32] : memref<10xf32, #tpu.memory_space<smem>>
    %c3_33 = arith.constant 3 : index
    %133 = memref.load %arg5[%c3_33] : memref<10xf32, #tpu.memory_space<smem>>
    %c4_34 = arith.constant 4 : index
    %134 = memref.load %arg5[%c4_34] : memref<10xf32, #tpu.memory_space<smem>>
    %c5_35 = arith.constant 5 : index
    %135 = memref.load %arg5[%c5_35] : memref<10xf32, #tpu.memory_space<smem>>
    %c6_36 = arith.constant 6 : index
    %136 = memref.load %arg5[%c6_36] : memref<10xf32, #tpu.memory_space<smem>>
    %c7_37 = arith.constant 7 : index
    %137 = memref.load %arg5[%c7_37] : memref<10xf32, #tpu.memory_space<smem>>
    %c8_38 = arith.constant 8 : index
    %138 = memref.load %arg5[%c8_38] : memref<10xf32, #tpu.memory_space<smem>>
    %c9_39 = arith.constant 9 : index
    %139 = memref.load %arg5[%c9_39] : memref<10xf32, #tpu.memory_space<smem>>
    %c1_40 = arith.constant 1 : index
    %140 = memref.load %arg6[%c1_40] : memref<20xf32, #tpu.memory_space<smem>>
    %c0_41 = arith.constant 0 : index
    %141 = memref.load %arg6[%c0_41] : memref<20xf32, #tpu.memory_space<smem>>
    %142 = arith.subf %140, %141 : f32
    %c3_42 = arith.constant 3 : index
    %143 = memref.load %arg6[%c3_42] : memref<20xf32, #tpu.memory_space<smem>>
    %c2_43 = arith.constant 2 : index
    %144 = memref.load %arg6[%c2_43] : memref<20xf32, #tpu.memory_space<smem>>
    %145 = arith.subf %143, %144 : f32
    %c5_44 = arith.constant 5 : index
    %146 = memref.load %arg6[%c5_44] : memref<20xf32, #tpu.memory_space<smem>>
    %c4_45 = arith.constant 4 : index
    %147 = memref.load %arg6[%c4_45] : memref<20xf32, #tpu.memory_space<smem>>
    %148 = arith.subf %146, %147 : f32
    %c7_46 = arith.constant 7 : index
    %149 = memref.load %arg6[%c7_46] : memref<20xf32, #tpu.memory_space<smem>>
    %c6_47 = arith.constant 6 : index
    %150 = memref.load %arg6[%c6_47] : memref<20xf32, #tpu.memory_space<smem>>
    %151 = arith.subf %149, %150 : f32
    %c9_48 = arith.constant 9 : index
    %152 = memref.load %arg6[%c9_48] : memref<20xf32, #tpu.memory_space<smem>>
    %c8_49 = arith.constant 8 : index
    %153 = memref.load %arg6[%c8_49] : memref<20xf32, #tpu.memory_space<smem>>
    %154 = arith.subf %152, %153 : f32
    %c11_50 = arith.constant 11 : index
    %155 = memref.load %arg6[%c11_50] : memref<20xf32, #tpu.memory_space<smem>>
    %c10_51 = arith.constant 10 : index
    %156 = memref.load %arg6[%c10_51] : memref<20xf32, #tpu.memory_space<smem>>
    %157 = arith.subf %155, %156 : f32
    %c13_52 = arith.constant 13 : index
    %158 = memref.load %arg6[%c13_52] : memref<20xf32, #tpu.memory_space<smem>>
    %c12_53 = arith.constant 12 : index
    %159 = memref.load %arg6[%c12_53] : memref<20xf32, #tpu.memory_space<smem>>
    %160 = arith.subf %158, %159 : f32
    %c15_54 = arith.constant 15 : index
    %161 = memref.load %arg6[%c15_54] : memref<20xf32, #tpu.memory_space<smem>>
    %c14_55 = arith.constant 14 : index
    %162 = memref.load %arg6[%c14_55] : memref<20xf32, #tpu.memory_space<smem>>
    %163 = arith.subf %161, %162 : f32
    %c17_56 = arith.constant 17 : index
    %164 = memref.load %arg6[%c17_56] : memref<20xf32, #tpu.memory_space<smem>>
    %c16_57 = arith.constant 16 : index
    %165 = memref.load %arg6[%c16_57] : memref<20xf32, #tpu.memory_space<smem>>
    %166 = arith.subf %164, %165 : f32
    %c19_58 = arith.constant 19 : index
    %167 = memref.load %arg6[%c19_58] : memref<20xf32, #tpu.memory_space<smem>>
    %c18_59 = arith.constant 18 : index
    %168 = memref.load %arg6[%c18_59] : memref<20xf32, #tpu.memory_space<smem>>
    %169 = arith.subf %167, %168 : f32
    %c1_60 = arith.constant 1 : index
    %170 = memref.load %arg7[%c1_60] : memref<2xf32, #tpu.memory_space<smem>>
    %c0_61 = arith.constant 0 : index
    %171 = memref.load %arg7[%c0_61] : memref<2xf32, #tpu.memory_space<smem>>
    %172 = arith.subf %170, %171 : f32
    %173 = tpu.iota {dimensions = array<i32: 1>} : vector<8x128xi32>
    %c1_i32 = arith.constant 1 : i32
    %174 = vector.broadcast %c1_i32 : i32 to vector<8x128xi32>
    %175 = arith.andi %173, %174 : vector<8x128xi32>
    %c0_i32 = arith.constant 0 : i32
    %176 = vector.broadcast %c0_i32 : i32 to vector<8x128xi32>
    %177 = arith.cmpi eq, %175, %176 : vector<8x128xi32>
    %c0_i32_62 = arith.constant 0 : i32
    %c16_i32 = arith.constant 16 : i32
    %178 = arith.muli %c0_i32_62, %c16_i32 : i32
    %179 = tpu.assume_multiple %178, 16 : i32
    %c8_i32 = arith.constant 8 : i32
    %180 = arith.addi %179, %c8_i32 : i32
    %181 = tpu.assume_multiple %180, 8 : i32
    %182 = arith.index_cast %179 : i32 to index
    %c0_63 = arith.constant 0 : index
    %183 = vector.load %arg1[%182, %c0_63] : memref<16x128xf32, #tpu.memory_space<vmem>>, vector<8x128xf32>
    %184 = arith.index_cast %181 : i32 to index
    %c0_64 = arith.constant 0 : index
    %185 = vector.load %arg1[%184, %c0_64] : memref<16x128xf32, #tpu.memory_space<vmem>>, vector<8x128xf32>
    %c127_i32 = arith.constant 127 : i32
    %186 = tpu.dynamic_rotate %183 by %c127_i32 dim 1 : vector<8x128xf32>, i32 -> vector<8x128xf32>
    %c1_i32_65 = arith.constant 1 : i32
    %187 = tpu.dynamic_rotate %185 by %c1_i32_65 dim 1 : vector<8x128xf32>, i32 -> vector<8x128xf32>
    %188 = arith.select %177, %183, %187 : vector<8x128xi1>, vector<8x128xf32>
    %189 = arith.select %177, %186, %185 : vector<8x128xi1>, vector<8x128xf32>
    %190 = vector.broadcast %0 : f32 to vector<8x128xf32>
    %191 = arith.mulf %188, %190 : vector<8x128xf32>
    %192 = vector.broadcast %10 : f32 to vector<8x128xf32>
    %193 = arith.mulf %189, %192 : vector<8x128xf32>
    %194 = arith.addf %191, %193 : vector<8x128xf32>
    %195 = vector.broadcast %20 : f32 to vector<8x128xf32>
    %196 = arith.addf %194, %195 : vector<8x128xf32>
    %cst = arith.constant 2.000000e-01 : f32
    %197 = vector.broadcast %cst : f32 to vector<8x128xf32>
    %198 = arith.mulf %197, %196 : vector<8x128xf32>
    %199 = arith.maximumf %196, %198 : vector<8x128xf32>
    %200 = vector.broadcast %1 : f32 to vector<8x128xf32>
    %201 = arith.mulf %188, %200 : vector<8x128xf32>
    %202 = vector.broadcast %11 : f32 to vector<8x128xf32>
    %203 = arith.mulf %189, %202 : vector<8x128xf32>
    %204 = arith.addf %201, %203 : vector<8x128xf32>
    %205 = vector.broadcast %21 : f32 to vector<8x128xf32>
    %206 = arith.addf %204, %205 : vector<8x128xf32>
    %cst_66 = arith.constant 2.000000e-01 : f32
    %207 = vector.broadcast %cst_66 : f32 to vector<8x128xf32>
    %208 = arith.mulf %207, %206 : vector<8x128xf32>
    %209 = arith.maximumf %206, %208 : vector<8x128xf32>
    %210 = vector.broadcast %2 : f32 to vector<8x128xf32>
    %211 = arith.mulf %188, %210 : vector<8x128xf32>
    %212 = vector.broadcast %12 : f32 to vector<8x128xf32>
    %213 = arith.mulf %189, %212 : vector<8x128xf32>
    %214 = arith.addf %211, %213 : vector<8x128xf32>
    %215 = vector.broadcast %22 : f32 to vector<8x128xf32>
    %216 = arith.addf %214, %215 : vector<8x128xf32>
    %cst_67 = arith.constant 2.000000e-01 : f32
    %217 = vector.broadcast %cst_67 : f32 to vector<8x128xf32>
    %218 = arith.mulf %217, %216 : vector<8x128xf32>
    %219 = arith.maximumf %216, %218 : vector<8x128xf32>
    %220 = vector.broadcast %3 : f32 to vector<8x128xf32>
    %221 = arith.mulf %188, %220 : vector<8x128xf32>
    %222 = vector.broadcast %13 : f32 to vector<8x128xf32>
    %223 = arith.mulf %189, %222 : vector<8x128xf32>
    %224 = arith.addf %221, %223 : vector<8x128xf32>
    %225 = vector.broadcast %23 : f32 to vector<8x128xf32>
    %226 = arith.addf %224, %225 : vector<8x128xf32>
    %cst_68 = arith.constant 2.000000e-01 : f32
    %227 = vector.broadcast %cst_68 : f32 to vector<8x128xf32>
    %228 = arith.mulf %227, %226 : vector<8x128xf32>
    %229 = arith.maximumf %226, %228 : vector<8x128xf32>
    %230 = vector.broadcast %4 : f32 to vector<8x128xf32>
    %231 = arith.mulf %188, %230 : vector<8x128xf32>
    %232 = vector.broadcast %14 : f32 to vector<8x128xf32>
    %233 = arith.mulf %189, %232 : vector<8x128xf32>
    %234 = arith.addf %231, %233 : vector<8x128xf32>
    %235 = vector.broadcast %24 : f32 to vector<8x128xf32>
    %236 = arith.addf %234, %235 : vector<8x128xf32>
    %cst_69 = arith.constant 2.000000e-01 : f32
    %237 = vector.broadcast %cst_69 : f32 to vector<8x128xf32>
    %238 = arith.mulf %237, %236 : vector<8x128xf32>
    %239 = arith.maximumf %236, %238 : vector<8x128xf32>
    %240 = vector.broadcast %5 : f32 to vector<8x128xf32>
    %241 = arith.mulf %188, %240 : vector<8x128xf32>
    %242 = vector.broadcast %15 : f32 to vector<8x128xf32>
    %243 = arith.mulf %189, %242 : vector<8x128xf32>
    %244 = arith.addf %241, %243 : vector<8x128xf32>
    %245 = vector.broadcast %25 : f32 to vector<8x128xf32>
    %246 = arith.addf %244, %245 : vector<8x128xf32>
    %cst_70 = arith.constant 2.000000e-01 : f32
    %247 = vector.broadcast %cst_70 : f32 to vector<8x128xf32>
    %248 = arith.mulf %247, %246 : vector<8x128xf32>
    %249 = arith.maximumf %246, %248 : vector<8x128xf32>
    %250 = vector.broadcast %6 : f32 to vector<8x128xf32>
    %251 = arith.mulf %188, %250 : vector<8x128xf32>
    %252 = vector.broadcast %16 : f32 to vector<8x128xf32>
    %253 = arith.mulf %189, %252 : vector<8x128xf32>
    %254 = arith.addf %251, %253 : vector<8x128xf32>
    %255 = vector.broadcast %26 : f32 to vector<8x128xf32>
    %256 = arith.addf %254, %255 : vector<8x128xf32>
    %cst_71 = arith.constant 2.000000e-01 : f32
    %257 = vector.broadcast %cst_71 : f32 to vector<8x128xf32>
    %258 = arith.mulf %257, %256 : vector<8x128xf32>
    %259 = arith.maximumf %256, %258 : vector<8x128xf32>
    %260 = vector.broadcast %7 : f32 to vector<8x128xf32>
    %261 = arith.mulf %188, %260 : vector<8x128xf32>
    %262 = vector.broadcast %17 : f32 to vector<8x128xf32>
    %263 = arith.mulf %189, %262 : vector<8x128xf32>
    %264 = arith.addf %261, %263 : vector<8x128xf32>
    %265 = vector.broadcast %27 : f32 to vector<8x128xf32>
    %266 = arith.addf %264, %265 : vector<8x128xf32>
    %cst_72 = arith.constant 2.000000e-01 : f32
    %267 = vector.broadcast %cst_72 : f32 to vector<8x128xf32>
    %268 = arith.mulf %267, %266 : vector<8x128xf32>
    %269 = arith.maximumf %266, %268 : vector<8x128xf32>
    %270 = vector.broadcast %8 : f32 to vector<8x128xf32>
    %271 = arith.mulf %188, %270 : vector<8x128xf32>
    %272 = vector.broadcast %18 : f32 to vector<8x128xf32>
    %273 = arith.mulf %189, %272 : vector<8x128xf32>
    %274 = arith.addf %271, %273 : vector<8x128xf32>
    %275 = vector.broadcast %28 : f32 to vector<8x128xf32>
    %276 = arith.addf %274, %275 : vector<8x128xf32>
    %cst_73 = arith.constant 2.000000e-01 : f32
    %277 = vector.broadcast %cst_73 : f32 to vector<8x128xf32>
    %278 = arith.mulf %277, %276 : vector<8x128xf32>
    %279 = arith.maximumf %276, %278 : vector<8x128xf32>
    %280 = vector.broadcast %9 : f32 to vector<8x128xf32>
    %281 = arith.mulf %188, %280 : vector<8x128xf32>
    %282 = vector.broadcast %19 : f32 to vector<8x128xf32>
    %283 = arith.mulf %189, %282 : vector<8x128xf32>
    %284 = arith.addf %281, %283 : vector<8x128xf32>
    %285 = vector.broadcast %29 : f32 to vector<8x128xf32>
    %286 = arith.addf %284, %285 : vector<8x128xf32>
    %cst_74 = arith.constant 2.000000e-01 : f32
    %287 = vector.broadcast %cst_74 : f32 to vector<8x128xf32>
    %288 = arith.mulf %287, %286 : vector<8x128xf32>
    %289 = arith.maximumf %286, %288 : vector<8x128xf32>
    %290 = vector.broadcast %30 : f32 to vector<8x128xf32>
    %291 = arith.mulf %199, %290 : vector<8x128xf32>
    %292 = vector.broadcast %130 : f32 to vector<8x128xf32>
    %293 = arith.addf %291, %292 : vector<8x128xf32>
    %294 = vector.broadcast %40 : f32 to vector<8x128xf32>
    %295 = arith.mulf %209, %294 : vector<8x128xf32>
    %296 = arith.addf %293, %295 : vector<8x128xf32>
    %297 = vector.broadcast %50 : f32 to vector<8x128xf32>
    %298 = arith.mulf %219, %297 : vector<8x128xf32>
    %299 = arith.addf %296, %298 : vector<8x128xf32>
    %300 = vector.broadcast %60 : f32 to vector<8x128xf32>
    %301 = arith.mulf %229, %300 : vector<8x128xf32>
    %302 = arith.addf %299, %301 : vector<8x128xf32>
    %303 = vector.broadcast %70 : f32 to vector<8x128xf32>
    %304 = arith.mulf %239, %303 : vector<8x128xf32>
    %305 = arith.addf %302, %304 : vector<8x128xf32>
    %306 = vector.broadcast %80 : f32 to vector<8x128xf32>
    %307 = arith.mulf %249, %306 : vector<8x128xf32>
    %308 = arith.addf %305, %307 : vector<8x128xf32>
    %309 = vector.broadcast %90 : f32 to vector<8x128xf32>
    %310 = arith.mulf %259, %309 : vector<8x128xf32>
    %311 = arith.addf %308, %310 : vector<8x128xf32>
    %312 = vector.broadcast %100 : f32 to vector<8x128xf32>
    %313 = arith.mulf %269, %312 : vector<8x128xf32>
    %314 = arith.addf %311, %313 : vector<8x128xf32>
    %315 = vector.broadcast %110 : f32 to vector<8x128xf32>
    %316 = arith.mulf %279, %315 : vector<8x128xf32>
    %317 = arith.addf %314, %316 : vector<8x128xf32>
    %318 = vector.broadcast %120 : f32 to vector<8x128xf32>
    %319 = arith.mulf %289, %318 : vector<8x128xf32>
    %320 = arith.addf %317, %319 : vector<8x128xf32>
    %cst_75 = arith.constant 2.000000e-01 : f32
    %321 = vector.broadcast %cst_75 : f32 to vector<8x128xf32>
    %322 = arith.mulf %321, %320 : vector<8x128xf32>
    %323 = arith.maximumf %320, %322 : vector<8x128xf32>
    %324 = vector.broadcast %31 : f32 to vector<8x128xf32>
    %325 = arith.mulf %199, %324 : vector<8x128xf32>
    %326 = vector.broadcast %131 : f32 to vector<8x128xf32>
    %327 = arith.addf %325, %326 : vector<8x128xf32>
    %328 = vector.broadcast %41 : f32 to vector<8x128xf32>
    %329 = arith.mulf %209, %328 : vector<8x128xf32>
    %330 = arith.addf %327, %329 : vector<8x128xf32>
    %331 = vector.broadcast %51 : f32 to vector<8x128xf32>
    %332 = arith.mulf %219, %331 : vector<8x128xf32>
    %333 = arith.addf %330, %332 : vector<8x128xf32>
    %334 = vector.broadcast %61 : f32 to vector<8x128xf32>
    %335 = arith.mulf %229, %334 : vector<8x128xf32>
    %336 = arith.addf %333, %335 : vector<8x128xf32>
    %337 = vector.broadcast %71 : f32 to vector<8x128xf32>
    %338 = arith.mulf %239, %337 : vector<8x128xf32>
    %339 = arith.addf %336, %338 : vector<8x128xf32>
    %340 = vector.broadcast %81 : f32 to vector<8x128xf32>
    %341 = arith.mulf %249, %340 : vector<8x128xf32>
    %342 = arith.addf %339, %341 : vector<8x128xf32>
    %343 = vector.broadcast %91 : f32 to vector<8x128xf32>
    %344 = arith.mulf %259, %343 : vector<8x128xf32>
    %345 = arith.addf %342, %344 : vector<8x128xf32>
    %346 = vector.broadcast %101 : f32 to vector<8x128xf32>
    %347 = arith.mulf %269, %346 : vector<8x128xf32>
    %348 = arith.addf %345, %347 : vector<8x128xf32>
    %349 = vector.broadcast %111 : f32 to vector<8x128xf32>
    %350 = arith.mulf %279, %349 : vector<8x128xf32>
    %351 = arith.addf %348, %350 : vector<8x128xf32>
    %352 = vector.broadcast %121 : f32 to vector<8x128xf32>
    %353 = arith.mulf %289, %352 : vector<8x128xf32>
    %354 = arith.addf %351, %353 : vector<8x128xf32>
    %cst_76 = arith.constant 2.000000e-01 : f32
    %355 = vector.broadcast %cst_76 : f32 to vector<8x128xf32>
    %356 = arith.mulf %355, %354 : vector<8x128xf32>
    %357 = arith.maximumf %354, %356 : vector<8x128xf32>
    %358 = vector.broadcast %32 : f32 to vector<8x128xf32>
    %359 = arith.mulf %199, %358 : vector<8x128xf32>
    %360 = vector.broadcast %132 : f32 to vector<8x128xf32>
    %361 = arith.addf %359, %360 : vector<8x128xf32>
    %362 = vector.broadcast %42 : f32 to vector<8x128xf32>
    %363 = arith.mulf %209, %362 : vector<8x128xf32>
    %364 = arith.addf %361, %363 : vector<8x128xf32>
    %365 = vector.broadcast %52 : f32 to vector<8x128xf32>
    %366 = arith.mulf %219, %365 : vector<8x128xf32>
    %367 = arith.addf %364, %366 : vector<8x128xf32>
    %368 = vector.broadcast %62 : f32 to vector<8x128xf32>
    %369 = arith.mulf %229, %368 : vector<8x128xf32>
    %370 = arith.addf %367, %369 : vector<8x128xf32>
    %371 = vector.broadcast %72 : f32 to vector<8x128xf32>
    %372 = arith.mulf %239, %371 : vector<8x128xf32>
    %373 = arith.addf %370, %372 : vector<8x128xf32>
    %374 = vector.broadcast %82 : f32 to vector<8x128xf32>
    %375 = arith.mulf %249, %374 : vector<8x128xf32>
    %376 = arith.addf %373, %375 : vector<8x128xf32>
    %377 = vector.broadcast %92 : f32 to vector<8x128xf32>
    %378 = arith.mulf %259, %377 : vector<8x128xf32>
    %379 = arith.addf %376, %378 : vector<8x128xf32>
    %380 = vector.broadcast %102 : f32 to vector<8x128xf32>
    %381 = arith.mulf %269, %380 : vector<8x128xf32>
    %382 = arith.addf %379, %381 : vector<8x128xf32>
    %383 = vector.broadcast %112 : f32 to vector<8x128xf32>
    %384 = arith.mulf %279, %383 : vector<8x128xf32>
    %385 = arith.addf %382, %384 : vector<8x128xf32>
    %386 = vector.broadcast %122 : f32 to vector<8x128xf32>
    %387 = arith.mulf %289, %386 : vector<8x128xf32>
    %388 = arith.addf %385, %387 : vector<8x128xf32>
    %cst_77 = arith.constant 2.000000e-01 : f32
    %389 = vector.broadcast %cst_77 : f32 to vector<8x128xf32>
    %390 = arith.mulf %389, %388 : vector<8x128xf32>
    %391 = arith.maximumf %388, %390 : vector<8x128xf32>
    %392 = vector.broadcast %33 : f32 to vector<8x128xf32>
    %393 = arith.mulf %199, %392 : vector<8x128xf32>
    %394 = vector.broadcast %133 : f32 to vector<8x128xf32>
    %395 = arith.addf %393, %394 : vector<8x128xf32>
    %396 = vector.broadcast %43 : f32 to vector<8x128xf32>
    %397 = arith.mulf %209, %396 : vector<8x128xf32>
    %398 = arith.addf %395, %397 : vector<8x128xf32>
    %399 = vector.broadcast %53 : f32 to vector<8x128xf32>
    %400 = arith.mulf %219, %399 : vector<8x128xf32>
    %401 = arith.addf %398, %400 : vector<8x128xf32>
    %402 = vector.broadcast %63 : f32 to vector<8x128xf32>
    %403 = arith.mulf %229, %402 : vector<8x128xf32>
    %404 = arith.addf %401, %403 : vector<8x128xf32>
    %405 = vector.broadcast %73 : f32 to vector<8x128xf32>
    %406 = arith.mulf %239, %405 : vector<8x128xf32>
    %407 = arith.addf %404, %406 : vector<8x128xf32>
    %408 = vector.broadcast %83 : f32 to vector<8x128xf32>
    %409 = arith.mulf %249, %408 : vector<8x128xf32>
    %410 = arith.addf %407, %409 : vector<8x128xf32>
    %411 = vector.broadcast %93 : f32 to vector<8x128xf32>
    %412 = arith.mulf %259, %411 : vector<8x128xf32>
    %413 = arith.addf %410, %412 : vector<8x128xf32>
    %414 = vector.broadcast %103 : f32 to vector<8x128xf32>
    %415 = arith.mulf %269, %414 : vector<8x128xf32>
    %416 = arith.addf %413, %415 : vector<8x128xf32>
    %417 = vector.broadcast %113 : f32 to vector<8x128xf32>
    %418 = arith.mulf %279, %417 : vector<8x128xf32>
    %419 = arith.addf %416, %418 : vector<8x128xf32>
    %420 = vector.broadcast %123 : f32 to vector<8x128xf32>
    %421 = arith.mulf %289, %420 : vector<8x128xf32>
    %422 = arith.addf %419, %421 : vector<8x128xf32>
    %cst_78 = arith.constant 2.000000e-01 : f32
    %423 = vector.broadcast %cst_78 : f32 to vector<8x128xf32>
    %424 = arith.mulf %423, %422 : vector<8x128xf32>
    %425 = arith.maximumf %422, %424 : vector<8x128xf32>
    %426 = vector.broadcast %34 : f32 to vector<8x128xf32>
    %427 = arith.mulf %199, %426 : vector<8x128xf32>
    %428 = vector.broadcast %134 : f32 to vector<8x128xf32>
    %429 = arith.addf %427, %428 : vector<8x128xf32>
    %430 = vector.broadcast %44 : f32 to vector<8x128xf32>
    %431 = arith.mulf %209, %430 : vector<8x128xf32>
    %432 = arith.addf %429, %431 : vector<8x128xf32>
    %433 = vector.broadcast %54 : f32 to vector<8x128xf32>
    %434 = arith.mulf %219, %433 : vector<8x128xf32>
    %435 = arith.addf %432, %434 : vector<8x128xf32>
    %436 = vector.broadcast %64 : f32 to vector<8x128xf32>
    %437 = arith.mulf %229, %436 : vector<8x128xf32>
    %438 = arith.addf %435, %437 : vector<8x128xf32>
    %439 = vector.broadcast %74 : f32 to vector<8x128xf32>
    %440 = arith.mulf %239, %439 : vector<8x128xf32>
    %441 = arith.addf %438, %440 : vector<8x128xf32>
    %442 = vector.broadcast %84 : f32 to vector<8x128xf32>
    %443 = arith.mulf %249, %442 : vector<8x128xf32>
    %444 = arith.addf %441, %443 : vector<8x128xf32>
    %445 = vector.broadcast %94 : f32 to vector<8x128xf32>
    %446 = arith.mulf %259, %445 : vector<8x128xf32>
    %447 = arith.addf %444, %446 : vector<8x128xf32>
    %448 = vector.broadcast %104 : f32 to vector<8x128xf32>
    %449 = arith.mulf %269, %448 : vector<8x128xf32>
    %450 = arith.addf %447, %449 : vector<8x128xf32>
    %451 = vector.broadcast %114 : f32 to vector<8x128xf32>
    %452 = arith.mulf %279, %451 : vector<8x128xf32>
    %453 = arith.addf %450, %452 : vector<8x128xf32>
    %454 = vector.broadcast %124 : f32 to vector<8x128xf32>
    %455 = arith.mulf %289, %454 : vector<8x128xf32>
    %456 = arith.addf %453, %455 : vector<8x128xf32>
    %cst_79 = arith.constant 2.000000e-01 : f32
    %457 = vector.broadcast %cst_79 : f32 to vector<8x128xf32>
    %458 = arith.mulf %457, %456 : vector<8x128xf32>
    %459 = arith.maximumf %456, %458 : vector<8x128xf32>
    %460 = vector.broadcast %35 : f32 to vector<8x128xf32>
    %461 = arith.mulf %199, %460 : vector<8x128xf32>
    %462 = vector.broadcast %135 : f32 to vector<8x128xf32>
    %463 = arith.addf %461, %462 : vector<8x128xf32>
    %464 = vector.broadcast %45 : f32 to vector<8x128xf32>
    %465 = arith.mulf %209, %464 : vector<8x128xf32>
    %466 = arith.addf %463, %465 : vector<8x128xf32>
    %467 = vector.broadcast %55 : f32 to vector<8x128xf32>
    %468 = arith.mulf %219, %467 : vector<8x128xf32>
    %469 = arith.addf %466, %468 : vector<8x128xf32>
    %470 = vector.broadcast %65 : f32 to vector<8x128xf32>
    %471 = arith.mulf %229, %470 : vector<8x128xf32>
    %472 = arith.addf %469, %471 : vector<8x128xf32>
    %473 = vector.broadcast %75 : f32 to vector<8x128xf32>
    %474 = arith.mulf %239, %473 : vector<8x128xf32>
    %475 = arith.addf %472, %474 : vector<8x128xf32>
    %476 = vector.broadcast %85 : f32 to vector<8x128xf32>
    %477 = arith.mulf %249, %476 : vector<8x128xf32>
    %478 = arith.addf %475, %477 : vector<8x128xf32>
    %479 = vector.broadcast %95 : f32 to vector<8x128xf32>
    %480 = arith.mulf %259, %479 : vector<8x128xf32>
    %481 = arith.addf %478, %480 : vector<8x128xf32>
    %482 = vector.broadcast %105 : f32 to vector<8x128xf32>
    %483 = arith.mulf %269, %482 : vector<8x128xf32>
    %484 = arith.addf %481, %483 : vector<8x128xf32>
    %485 = vector.broadcast %115 : f32 to vector<8x128xf32>
    %486 = arith.mulf %279, %485 : vector<8x128xf32>
    %487 = arith.addf %484, %486 : vector<8x128xf32>
    %488 = vector.broadcast %125 : f32 to vector<8x128xf32>
    %489 = arith.mulf %289, %488 : vector<8x128xf32>
    %490 = arith.addf %487, %489 : vector<8x128xf32>
    %cst_80 = arith.constant 2.000000e-01 : f32
    %491 = vector.broadcast %cst_80 : f32 to vector<8x128xf32>
    %492 = arith.mulf %491, %490 : vector<8x128xf32>
    %493 = arith.maximumf %490, %492 : vector<8x128xf32>
    %494 = vector.broadcast %36 : f32 to vector<8x128xf32>
    %495 = arith.mulf %199, %494 : vector<8x128xf32>
    %496 = vector.broadcast %136 : f32 to vector<8x128xf32>
    %497 = arith.addf %495, %496 : vector<8x128xf32>
    %498 = vector.broadcast %46 : f32 to vector<8x128xf32>
    %499 = arith.mulf %209, %498 : vector<8x128xf32>
    %500 = arith.addf %497, %499 : vector<8x128xf32>
    %501 = vector.broadcast %56 : f32 to vector<8x128xf32>
    %502 = arith.mulf %219, %501 : vector<8x128xf32>
    %503 = arith.addf %500, %502 : vector<8x128xf32>
    %504 = vector.broadcast %66 : f32 to vector<8x128xf32>
    %505 = arith.mulf %229, %504 : vector<8x128xf32>
    %506 = arith.addf %503, %505 : vector<8x128xf32>
    %507 = vector.broadcast %76 : f32 to vector<8x128xf32>
    %508 = arith.mulf %239, %507 : vector<8x128xf32>
    %509 = arith.addf %506, %508 : vector<8x128xf32>
    %510 = vector.broadcast %86 : f32 to vector<8x128xf32>
    %511 = arith.mulf %249, %510 : vector<8x128xf32>
    %512 = arith.addf %509, %511 : vector<8x128xf32>
    %513 = vector.broadcast %96 : f32 to vector<8x128xf32>
    %514 = arith.mulf %259, %513 : vector<8x128xf32>
    %515 = arith.addf %512, %514 : vector<8x128xf32>
    %516 = vector.broadcast %106 : f32 to vector<8x128xf32>
    %517 = arith.mulf %269, %516 : vector<8x128xf32>
    %518 = arith.addf %515, %517 : vector<8x128xf32>
    %519 = vector.broadcast %116 : f32 to vector<8x128xf32>
    %520 = arith.mulf %279, %519 : vector<8x128xf32>
    %521 = arith.addf %518, %520 : vector<8x128xf32>
    %522 = vector.broadcast %126 : f32 to vector<8x128xf32>
    %523 = arith.mulf %289, %522 : vector<8x128xf32>
    %524 = arith.addf %521, %523 : vector<8x128xf32>
    %cst_81 = arith.constant 2.000000e-01 : f32
    %525 = vector.broadcast %cst_81 : f32 to vector<8x128xf32>
    %526 = arith.mulf %525, %524 : vector<8x128xf32>
    %527 = arith.maximumf %524, %526 : vector<8x128xf32>
    %528 = vector.broadcast %37 : f32 to vector<8x128xf32>
    %529 = arith.mulf %199, %528 : vector<8x128xf32>
    %530 = vector.broadcast %137 : f32 to vector<8x128xf32>
    %531 = arith.addf %529, %530 : vector<8x128xf32>
    %532 = vector.broadcast %47 : f32 to vector<8x128xf32>
    %533 = arith.mulf %209, %532 : vector<8x128xf32>
    %534 = arith.addf %531, %533 : vector<8x128xf32>
    %535 = vector.broadcast %57 : f32 to vector<8x128xf32>
    %536 = arith.mulf %219, %535 : vector<8x128xf32>
    %537 = arith.addf %534, %536 : vector<8x128xf32>
    %538 = vector.broadcast %67 : f32 to vector<8x128xf32>
    %539 = arith.mulf %229, %538 : vector<8x128xf32>
    %540 = arith.addf %537, %539 : vector<8x128xf32>
    %541 = vector.broadcast %77 : f32 to vector<8x128xf32>
    %542 = arith.mulf %239, %541 : vector<8x128xf32>
    %543 = arith.addf %540, %542 : vector<8x128xf32>
    %544 = vector.broadcast %87 : f32 to vector<8x128xf32>
    %545 = arith.mulf %249, %544 : vector<8x128xf32>
    %546 = arith.addf %543, %545 : vector<8x128xf32>
    %547 = vector.broadcast %97 : f32 to vector<8x128xf32>
    %548 = arith.mulf %259, %547 : vector<8x128xf32>
    %549 = arith.addf %546, %548 : vector<8x128xf32>
    %550 = vector.broadcast %107 : f32 to vector<8x128xf32>
    %551 = arith.mulf %269, %550 : vector<8x128xf32>
    %552 = arith.addf %549, %551 : vector<8x128xf32>
    %553 = vector.broadcast %117 : f32 to vector<8x128xf32>
    %554 = arith.mulf %279, %553 : vector<8x128xf32>
    %555 = arith.addf %552, %554 : vector<8x128xf32>
    %556 = vector.broadcast %127 : f32 to vector<8x128xf32>
    %557 = arith.mulf %289, %556 : vector<8x128xf32>
    %558 = arith.addf %555, %557 : vector<8x128xf32>
    %cst_82 = arith.constant 2.000000e-01 : f32
    %559 = vector.broadcast %cst_82 : f32 to vector<8x128xf32>
    %560 = arith.mulf %559, %558 : vector<8x128xf32>
    %561 = arith.maximumf %558, %560 : vector<8x128xf32>
    %562 = vector.broadcast %38 : f32 to vector<8x128xf32>
    %563 = arith.mulf %199, %562 : vector<8x128xf32>
    %564 = vector.broadcast %138 : f32 to vector<8x128xf32>
    %565 = arith.addf %563, %564 : vector<8x128xf32>
    %566 = vector.broadcast %48 : f32 to vector<8x128xf32>
    %567 = arith.mulf %209, %566 : vector<8x128xf32>
    %568 = arith.addf %565, %567 : vector<8x128xf32>
    %569 = vector.broadcast %58 : f32 to vector<8x128xf32>
    %570 = arith.mulf %219, %569 : vector<8x128xf32>
    %571 = arith.addf %568, %570 : vector<8x128xf32>
    %572 = vector.broadcast %68 : f32 to vector<8x128xf32>
    %573 = arith.mulf %229, %572 : vector<8x128xf32>
    %574 = arith.addf %571, %573 : vector<8x128xf32>
    %575 = vector.broadcast %78 : f32 to vector<8x128xf32>
    %576 = arith.mulf %239, %575 : vector<8x128xf32>
    %577 = arith.addf %574, %576 : vector<8x128xf32>
    %578 = vector.broadcast %88 : f32 to vector<8x128xf32>
    %579 = arith.mulf %249, %578 : vector<8x128xf32>
    %580 = arith.addf %577, %579 : vector<8x128xf32>
    %581 = vector.broadcast %98 : f32 to vector<8x128xf32>
    %582 = arith.mulf %259, %581 : vector<8x128xf32>
    %583 = arith.addf %580, %582 : vector<8x128xf32>
    %584 = vector.broadcast %108 : f32 to vector<8x128xf32>
    %585 = arith.mulf %269, %584 : vector<8x128xf32>
    %586 = arith.addf %583, %585 : vector<8x128xf32>
    %587 = vector.broadcast %118 : f32 to vector<8x128xf32>
    %588 = arith.mulf %279, %587 : vector<8x128xf32>
    %589 = arith.addf %586, %588 : vector<8x128xf32>
    %590 = vector.broadcast %128 : f32 to vector<8x128xf32>
    %591 = arith.mulf %289, %590 : vector<8x128xf32>
    %592 = arith.addf %589, %591 : vector<8x128xf32>
    %cst_83 = arith.constant 2.000000e-01 : f32
    %593 = vector.broadcast %cst_83 : f32 to vector<8x128xf32>
    %594 = arith.mulf %593, %592 : vector<8x128xf32>
    %595 = arith.maximumf %592, %594 : vector<8x128xf32>
    %596 = vector.broadcast %39 : f32 to vector<8x128xf32>
    %597 = arith.mulf %199, %596 : vector<8x128xf32>
    %598 = vector.broadcast %139 : f32 to vector<8x128xf32>
    %599 = arith.addf %597, %598 : vector<8x128xf32>
    %600 = vector.broadcast %49 : f32 to vector<8x128xf32>
    %601 = arith.mulf %209, %600 : vector<8x128xf32>
    %602 = arith.addf %599, %601 : vector<8x128xf32>
    %603 = vector.broadcast %59 : f32 to vector<8x128xf32>
    %604 = arith.mulf %219, %603 : vector<8x128xf32>
    %605 = arith.addf %602, %604 : vector<8x128xf32>
    %606 = vector.broadcast %69 : f32 to vector<8x128xf32>
    %607 = arith.mulf %229, %606 : vector<8x128xf32>
    %608 = arith.addf %605, %607 : vector<8x128xf32>
    %609 = vector.broadcast %79 : f32 to vector<8x128xf32>
    %610 = arith.mulf %239, %609 : vector<8x128xf32>
    %611 = arith.addf %608, %610 : vector<8x128xf32>
    %612 = vector.broadcast %89 : f32 to vector<8x128xf32>
    %613 = arith.mulf %249, %612 : vector<8x128xf32>
    %614 = arith.addf %611, %613 : vector<8x128xf32>
    %615 = vector.broadcast %99 : f32 to vector<8x128xf32>
    %616 = arith.mulf %259, %615 : vector<8x128xf32>
    %617 = arith.addf %614, %616 : vector<8x128xf32>
    %618 = vector.broadcast %109 : f32 to vector<8x128xf32>
    %619 = arith.mulf %269, %618 : vector<8x128xf32>
    %620 = arith.addf %617, %619 : vector<8x128xf32>
    %621 = vector.broadcast %119 : f32 to vector<8x128xf32>
    %622 = arith.mulf %279, %621 : vector<8x128xf32>
    %623 = arith.addf %620, %622 : vector<8x128xf32>
    %624 = vector.broadcast %129 : f32 to vector<8x128xf32>
    %625 = arith.mulf %289, %624 : vector<8x128xf32>
    %626 = arith.addf %623, %625 : vector<8x128xf32>
    %cst_84 = arith.constant 2.000000e-01 : f32
    %627 = vector.broadcast %cst_84 : f32 to vector<8x128xf32>
    %628 = arith.mulf %627, %626 : vector<8x128xf32>
    %629 = arith.maximumf %626, %628 : vector<8x128xf32>
    %630 = vector.broadcast %142 : f32 to vector<8x128xf32>
    %631 = arith.mulf %323, %630 : vector<8x128xf32>
    %632 = vector.broadcast %172 : f32 to vector<8x128xf32>
    %633 = arith.addf %631, %632 : vector<8x128xf32>
    %634 = vector.broadcast %145 : f32 to vector<8x128xf32>
    %635 = arith.mulf %357, %634 : vector<8x128xf32>
    %636 = arith.addf %633, %635 : vector<8x128xf32>
    %637 = vector.broadcast %148 : f32 to vector<8x128xf32>
    %638 = arith.mulf %391, %637 : vector<8x128xf32>
    %639 = arith.addf %636, %638 : vector<8x128xf32>
    %640 = vector.broadcast %151 : f32 to vector<8x128xf32>
    %641 = arith.mulf %425, %640 : vector<8x128xf32>
    %642 = arith.addf %639, %641 : vector<8x128xf32>
    %643 = vector.broadcast %154 : f32 to vector<8x128xf32>
    %644 = arith.mulf %459, %643 : vector<8x128xf32>
    %645 = arith.addf %642, %644 : vector<8x128xf32>
    %646 = vector.broadcast %157 : f32 to vector<8x128xf32>
    %647 = arith.mulf %493, %646 : vector<8x128xf32>
    %648 = arith.addf %645, %647 : vector<8x128xf32>
    %649 = vector.broadcast %160 : f32 to vector<8x128xf32>
    %650 = arith.mulf %527, %649 : vector<8x128xf32>
    %651 = arith.addf %648, %650 : vector<8x128xf32>
    %652 = vector.broadcast %163 : f32 to vector<8x128xf32>
    %653 = arith.mulf %561, %652 : vector<8x128xf32>
    %654 = arith.addf %651, %653 : vector<8x128xf32>
    %655 = vector.broadcast %166 : f32 to vector<8x128xf32>
    %656 = arith.mulf %595, %655 : vector<8x128xf32>
    %657 = arith.addf %654, %656 : vector<8x128xf32>
    %658 = vector.broadcast %169 : f32 to vector<8x128xf32>
    %659 = arith.mulf %629, %658 : vector<8x128xf32>
    %660 = arith.addf %657, %659 : vector<8x128xf32>
    %661 = math.exp %660 : vector<8x128xf32>
    %cst_85 = arith.constant 1.000000e+00 : f32
    %662 = vector.broadcast %cst_85 : f32 to vector<8x128xf32>
    %663 = arith.addf %662, %661 : vector<8x128xf32>
    %cst_86 = arith.constant 1.000000e+00 : f32
    %664 = vector.broadcast %cst_86 : f32 to vector<8x128xf32>
    %665 = arith.divf %664, %663 : vector<8x128xf32>
    %cst_87 = arith.constant 1.000000e+00 : f32
    %666 = vector.broadcast %cst_87 : f32 to vector<8x128xf32>
    %667 = arith.subf %666, %665 : vector<8x128xf32>
    %c1_i32_88 = arith.constant 1 : i32
    %668 = tpu.dynamic_rotate %667 by %c1_i32_88 dim 1 : vector<8x128xf32>, i32 -> vector<8x128xf32>
    %669 = arith.select %177, %665, %668 : vector<8x128xi1>, vector<8x128xf32>
    %670 = arith.index_cast %179 : i32 to index
    %c0_89 = arith.constant 0 : index
    %671 = vector.load %arg8[%670, %c0_89] : memref<16x128xf32, #tpu.memory_space<vmem>>, vector<8x128xf32>
    tpu.vector_store %arg8[%670, %c0_89], %669 {strides = array<i32>} : memref<16x128xf32, #tpu.memory_space<vmem>>, vector<8x128xf32>,
    %c127_i32_90 = arith.constant 127 : i32
    %672 = tpu.dynamic_rotate %665 by %c127_i32_90 dim 1 : vector<8x128xf32>, i32 -> vector<8x128xf32>
    %673 = arith.select %177, %672, %667 : vector<8x128xi1>, vector<8x128xf32>
    %674 = arith.index_cast %181 : i32 to index
    %c0_91 = arith.constant 0 : index
    %675 = vector.load %arg8[%674, %c0_91] : memref<16x128xf32, #tpu.memory_space<vmem>>, vector<8x128xf32>
    tpu.vector_store %arg8[%674, %c0_91], %673 {strides = array<i32>} : memref<16x128xf32, #tpu.memory_space<vmem>>, vector<8x128xf32>,
    %c1_i32_92 = arith.constant 1 : i32
    return
  }
  func.func @transform_0(%arg0: i32) -> (i32, i32) {
    %c0_i32 = arith.constant 0 : i32
    %c0_i32_0 = arith.constant 0 : i32
    return %arg0, %c0_i32 : i32, i32
  }
  func.func @transform_1(%arg0: i32) -> i32 {
    %c0_i32 = arith.constant 0 : i32
    %c0_i32_0 = arith.constant 0 : i32
    return %c0_i32 : i32
  }
  func.func @transform_2(%arg0: i32) -> i32 {
    %c0_i32 = arith.constant 0 : i32
    %c0_i32_0 = arith.constant 0 : i32
    return %c0_i32 : i32
  }
  func.func @transform_3(%arg0: i32) -> i32 {
    %c0_i32 = arith.constant 0 : i32
    %c0_i32_0 = arith.constant 0 : i32
    return %c0_i32 : i32
  }
  func.func @transform_4(%arg0: i32) -> i32 {
    %c0_i32 = arith.constant 0 : i32
    %c0_i32_0 = arith.constant 0 : i32
    return %c0_i32 : i32
  }
  func.func @transform_5(%arg0: i32) -> i32 {
    %c0_i32 = arith.constant 0 : i32
    %c0_i32_0 = arith.constant 0 : i32
    return %c0_i32 : i32
  }
  func.func @transform_6(%arg0: i32) -> i32 {
    %c0_i32 = arith.constant 0 : i32
    %c0_i32_0 = arith.constant 0 : i32
    return %c0_i32 : i32
  }
  func.func @transform_7(%arg0: i32) -> (i32, i32) {
    %c0_i32 = arith.constant 0 : i32
    %c0_i32_0 = arith.constant 0 : i32
    return %arg0, %c0_i32 : i32, i32
  }
}

</mosaic_0001>

<bundles_post_ra>
// kernel: _classifier_forward_jit.1
= control target key start
LH: loop header
LB: loop body
LE: loop exit
PB: predicated region body
PF: predicated region fallthrough
CT: control target
= control target key end

     0   :  { %s1862_s0 = inlined_call_operand.vmem [shape: f32[16,128], index: 0, kind: input, shape index: {}]   ;;  %s1863_s1 = inlined_call_operand.vmem [shape: f32[20], index: 1, kind: input, shape index: {}]   ;;  %s1864_s2 = inlined_call_operand.vmem [shape: f32[10], index: 2, kind: input, shape index: {}]   ;;  %s1865_s3 = inlined_call_operand.vmem [shape: f32[100], index: 3, kind: input, shape index: {}]   ;;  %s1866_s4 = inlined_call_operand.vmem [shape: f32[10], index: 4, kind: input, shape index: {}]   ;;  %s1867_s5 = inlined_call_operand.vmem [shape: f32[20], index: 5, kind: input, shape index: {}]   ;;  %s1868_s6 = inlined_call_operand.vmem [shape: f32[2], index: 6, kind: input, shape index: {}]   ;;  %s1869_s7 = inlined_call_operand.vmem [shape: f32[16,128], index: 7, kind: output, shape index: {}]  }
   0x1   :  { %1880 = sst [smem:[#allocation55_spill]] %s1869_s7 }
   0x2   :  { %12 = vsyncpa [#allocation3], 0 }
   0x3   :  { %13 = vsyncpa [#allocation5], 0 }
   0x4   :  { %14 = vsyncpa [#allocation8], 0  ;;  %s32_s26 = sshll.u32 %s1864_s2, 4  ;;  %s33_s26 = int_to_ptr.vmem [resolvable:$true] %s32_s26 }
   0x5   :  { %15 = vsyncpa [#allocation11], 0  ;;  %s50_s29 = sshll.u32 %s1866_s4, 4  ;;  %s1023_s30 = smov [#allocation4]   ;;  %s51_s29 = int_to_ptr.vmem [resolvable:$true] %s50_s29 }
   0x6   :  { %35 = dma.vmem_to_smem %s33_s26, 16, %s1023_s30, [#allocation5]  }
   0x7   :  { %s1024_s8 = smov [#allocation7]   ;;  %s23_s11 = sshll.u32 %s1863_s1, 4  ;;  %s24_s11 = int_to_ptr.vmem [resolvable:$true] %s23_s11 }
   0x8   :  { %53 = dma.vmem_to_smem %s51_s29, 16, %s1024_s8, [#allocation8]  }
   0x9   :  { %s41_s2 = sshll.u32 %s1865_s3, 4  ;;  %s1025_s14 = smov [#allocation2]   ;;  %s42_s2 = int_to_ptr.vmem [resolvable:$true] %s41_s2 }
   0xa   :  { %26 = dma.vmem_to_smem %s24_s11, 16, %s1025_s14, [#allocation3]  }
   0xb   :  { %s1026_s15 = smov [#allocation6]   ;;  %s59_s17 = sshll.u32 %s1867_s5, 4  ;;  %s60_s17 = int_to_ptr.vmem [resolvable:$true] %s59_s17 }
   0xc   :  { %44 = dma.vmem_to_smem %s42_s2, 16, %s1026_s15, [#allocation5]  }
   0xd   :  { %s68_s20 = sshll.u32 %s1868_s6, 4  ;;  %s1027_s1 = smov [#allocation9]   ;;  %s69_s20 = int_to_ptr.vmem [resolvable:$true] %s68_s20 }
   0xe   :  { %62 = dma.vmem_to_smem %s60_s17, 16, %s1027_s1, [#allocation8]  }
   0xf   :  { %s1028_s21 = smov [#allocation10]  }
  0x10   :  { %71 = dma.vmem_to_smem %s69_s20, 16, %s1028_s21, [#allocation11]  }
  0x11   :  { %1015 = dma.done.wait [#allocation3], 16  }
  0x12   :  { %1016 = vsyncadd [#allocation3], 4294967280 }
  0x13   :  { %1017 = dma.done.wait [#allocation5], 32  }
  0x14   :  { %1018 = vsyncadd [#allocation5], 4294967264 }
  0x15   :  { %1019 = dma.done.wait [#allocation8], 32  }
  0x16   :  { %1020 = vsyncadd [#allocation8], 4294967264 }
  0x17   :  { %1021 = dma.done.wait [#allocation11], 16  }
  0x18   :  { %1022 = vsyncadd [#allocation11], 4294967280 }
  0x19   :  { %96 = sfence }
  0x1a   :  { %v1092_v0 = vld [vmem:[%s1862_s0] sm:$0xff]  ;;  %s1870_s6 = smov 127   ;;  %v1099_v1 = vld [vmem:[%s1862_s0 + $0x8] sm:$0xff]  ;;  %s1871_s24 = smov 1   ;;  %v270_v2 = vlaneseq }
  0x1b   :  { %278 = vrot.lane.b32.xlu0 %v1092_v0, %s1870_s6  ;;  %s1103_s25 = sld [smem:[#allocation2]] }
  0x1c   :  { %s1105_s26 = sld [smem:[#allocation2 + $0x1]]  ;;  %v271_v3 = vand.u32 127, %v270_v2 }
  0x1d   :  { %s1107_s27 = sld [smem:[#allocation2 + $0x2]] }
  0x1e   :  { %s1109_s28 = sld [smem:[#allocation2 + $0x3]]  ;;  %v272_v4 = vand.u32 1, %v271_v3 }
  0x1f   :  { %s1111_s29 = sld [smem:[#allocation2 + $0x4]] }
  0x20   :  { %s1113_s30 = sld [smem:[#allocation2 + $0x5]]  ;;  %vm1235_vm0 = vcmp.eq.s32.totalorder %v272_v4, 0 }
  0x21   :  { %s1115_s8 = sld [smem:[#allocation2 + $0x6]]  ;;  %v284_v17 = vstv %s1103_s25 }
  0x22   :  { %s1117_s0 = sld [smem:[#allocation2 + $0x7]]  ;;  %v293_v18 = vstv %s1105_s26 }
  0x23   :  { %280 = vrot.lane.b32.xlu0 %v1099_v1, %s1871_s24  ;;  %s1119_s9 = sld [smem:[#allocation2 + $0x8]]  ;;  %v302_v19 = vstv %s1107_s27 }
  0x24   :  { %s1121_s10 = sld [smem:[#allocation2 + $0x9]]  ;;  %v311_v20 = vstv %s1109_s28 }
  0x25   :  { %s1123_s11 = sld [smem:[#allocation2 + $0xa]]  ;;  %v320_v21 = vstv %s1111_s29 }
  0x26   :  { %s1125_s12 = sld [smem:[#allocation2 + $0xb]]  ;;  %v329_v22 = vstv %s1113_s30 }
  0x27   :  { %s1127_s13 = sld [smem:[#allocation2 + $0xc]]  ;;  %v338_v23 = vstv %s1115_s8 }
  0x28   :  { %s1129_s2 = sld [smem:[#allocation2 + $0xd]]  ;;  %v347_v24 = vstv %s1117_s0 }
  0x29   :  { %s1131_s14 = sld [smem:[#allocation2 + $0xe]]  ;;  %v356_v27 = vstv %s1119_s9 }
  0x2a   :  { %1881 = sst [smem:[#allocation16_spill]] %s1121_s10 }
  0x2b   :  { %s1133_s15 = sld [smem:[#allocation2 + $0xf]]  ;;  %v286_v6 = vstv %s1123_s11 }
  0x2c   :  { %s1135_s4 = sld [smem:[#allocation2 + $0x10]]  ;;  %v295_v7 = vstv %s1125_s12 }
  0x2d   :  { %s1137_s16 = sld [smem:[#allocation2 + $0x11]]  ;;  %v304_v8 = vstv %s1127_s13 }
  0x2e   :  { %s1139_s17 = sld [smem:[#allocation2 + $0x12]]  ;;  %v313_v9 = vstv %s1129_s2 }
  0x2f   :  { %s1141_s18 = sld [smem:[#allocation2 + $0x13]]  ;;  %v322_v10 = vstv %s1131_s14 }
  0x30   :  { %s1143_s19 = sld [smem:[#allocation4]] }
  0x31   :  { %s1145_s20 = sld [smem:[#allocation4 + $0x1]]  ;;  %v331_v11 = vstv %s1133_s15 }
  0x32   :  { %s1147_s1 = sld [smem:[#allocation4 + $0x2]]  ;;  %v340_v12 = vstv %s1135_s4 }
  0x33   :  { %s1149_s21 = sld [smem:[#allocation4 + $0x3]]  ;;  %v349_v13 = vstv %s1137_s16 }
  0x34   :  { %s1151_s3 = sld [smem:[#allocation4 + $0x4]]  ;;  %v358_v14 = vstv %s1139_s17 }
  0x35   :  { %s1153_s5 = sld [smem:[#allocation4 + $0x5]]  ;;  %v367_v15 = vstv %s1141_s18 }
  0x36   :  { %s1155_s22 = sld [smem:[#allocation4 + $0x6]]  ;;  %v289_v26 = vstv %s1143_s19 }
  0x37   :  { %1882 = sst [smem:[#allocation17_spill]] %s1145_s20 }
  0x38   :  { %1883 = sst [smem:[#allocation18_spill]] %s1147_s1 }
  0x39   :  { %1884 = sst [smem:[#allocation19_spill]] %s1149_s21 }
  0x3a   :  { %1885 = sst [smem:[#allocation20_spill]] %s1151_s3 }
  0x3b   :  { %1886 = sst [smem:[#allocation21_spill]] %s1153_s5 }
  0x3c   :  { %1887 = sst [smem:[#allocation22_spill]] %s1155_s22 }
  0x3d   :  { %s1157_s23 = sld [smem:[#allocation4 + $0x7]] }
  0x3e   :  { %s1159_s6 = sld [smem:[#allocation4 + $0x8]] }
  0x3f   :  { %s1161_s24 = sld [smem:[#allocation4 + $0x9]] }
  0x40   :  { %s1163_s7 = sld [smem:[#allocation6]] }
  0x41   :  { %s1165_s10 = sld [smem:[#allocation6 + $0x1]] }
  0x42   :  { %s1167_s20 = sld [smem:[#allocation6 + $0x2]] }
  0x43   :  { %1888 = sst [smem:[#allocation23_spill]] %s1157_s23 }
  0x44   :  { %1889 = sst [smem:[#allocation24_spill]] %s1159_s6 }
  0x45   :  { %1890 = sst [smem:[#allocation25_spill]] %s1161_s24 }
  0x46   :  { %1891 = sst [smem:[#allocation26_spill]] %s1163_s7 }
  0x47   :  { %1892 = sst [smem:[#allocation27_spill]] %s1165_s10 }
  0x48   :  { %1893 = sst [smem:[#allocation28_spill]] %s1167_s20 }
  0x49   :  { %s1169_s1 = sld [smem:[#allocation6 + $0x3]] }
  0x4a   :  { %s1171_s21 = sld [smem:[#allocation6 + $0x4]] }
  0x4b   :  { %s1173_s3 = sld [smem:[#allocation6 + $0x5]] }
  0x4c   :  { %s1175_s5 = sld [smem:[#allocation6 + $0x6]] }
  0x4d   :  { %s1177_s22 = sld [smem:[#allocation6 + $0x7]] }
  0x4e   :  { %s1179_s23 = sld [smem:[#allocation6 + $0x8]] }
  0x4f   :  { %1894 = sst [smem:[#allocation29_spill]] %s1169_s1 }
  0x50   :  { %1895 = sst [smem:[#allocation30_spill]] %s1171_s21 }
  0x51   :  { %1896 = sst [smem:[#allocation31_spill]] %s1173_s3 }
  0x52   :  { %1897 = sst [smem:[#allocation32_spill]] %s1175_s5 }
  0x53   :  { %1898 = sst [smem:[#allocation33_spill]] %s1177_s22 }
  0x54   :  { %1899 = sst [smem:[#allocation34_spill]] %s1179_s23 }
  0x55   :  { %s1181_s6 = sld [smem:[#allocation6 + $0x9]] }
  0x56   :  { %s1183_s24 = sld [smem:[#allocation6 + $0xa]] }
  0x57   :  { %s1185_s7 = sld [smem:[#allocation6 + $0xb]] }
  0x58   :  { %s1187_s10 = sld [smem:[#allocation6 + $0xc]] }
  0x59   :  { %s1189_s20 = sld [smem:[#allocation6 + $0xd]] }
  0x5a   :  { %s1191_s1 = sld [smem:[#allocation6 + $0xe]] }
  0x5b   :  { %1900 = sst [smem:[#allocation35_spill]] %s1181_s6 }
  0x5c   :  { %1901 = sst [smem:[#allocation36_spill]] %s1183_s24 }
  0x5d   :  { %1902 = sst [smem:[#allocation37_spill]] %s1185_s7 }
  0x5e   :  { %1903 = sst [smem:[#allocation38_spill]] %s1187_s10 }
  0x5f   :  { %1904 = sst [smem:[#allocation39_spill]] %s1189_s20 }
  0x60   :  { %1905 = sst [smem:[#allocation40_spill]] %s1191_s1 }
  0x61   :  { %s1193_s21 = sld [smem:[#allocation6 + $0xf]] }
  0x62   :  { %s1195_s3 = sld [smem:[#allocation6 + $0x10]] }
  0x63   :  { %s1197_s5 = sld [smem:[#allocation6 + $0x11]] }
  0x64   :  { %s1199_s22 = sld [smem:[#allocation6 + $0x12]] }
  0x65   :  { %s1201_s23 = sld [smem:[#allocation6 + $0x13]] }
  0x66   :  { %s1203_s6 = sld [smem:[#allocation6 + $0x14]] }
  0x67   :  { %1906 = sst [smem:[#allocation41_spill]] %s1193_s21 }
  0x68   :  { %1907 = sst [smem:[#allocation42_spill]] %s1195_s3 }
  0x69   :  { %1908 = sst [smem:[#allocation43_spill]] %s1197_s5 }
  0x6a   :  { %1909 = sst [smem:[#allocation44_spill]] %s1199_s22 }
  0x6b   :  { %1910 = sst [smem:[#allocation45_spill]] %s1201_s23 }
  0x6c   :  { %s1205_s24 = sld [smem:[#allocation6 + $0x15]]  ;;  %v381_v51 = vstv %s1203_s6 }
  0x6d   :  { %s1207_s7 = sld [smem:[#allocation6 + $0x16]] }
  0x6e   :  { %s1209_s10 = sld [smem:[#allocation6 + $0x17]] }
  0x6f   :  { %s1211_s1 = sld [smem:[#allocation6 + $0x18]] }
  0x70   :  { %s1213_s3 = sld [smem:[#allocation6 + $0x19]] }
  0x71   :  { %s1215_s5 = sld [smem:[#allocation6 + $0x1a]] }
  0x72   :  { %s1217_s22 = sld [smem:[#allocation6 + $0x1b]] }
  0x73   :  { %s1219_s23 = sld [smem:[#allocation6 + $0x1c]] }
  0x74   :  { %1911 = sst [smem:[#allocation46_spill]] %s1209_s10 }
  0x75   :  { %1912 = sst [smem:[#allocation47_spill]] %s1211_s1 }
  0x76   :  { %1913 = sst [smem:[#allocation48_spill]] %s1213_s3 }
  0x77   :  { %1914 = sst [smem:[#allocation49_spill]] %s1215_s5 }
  0x78   :  { %1915 = sst [smem:[#allocation50_spill]] %s1217_s22 }
  0x79   :  { %1916 = sst [smem:[#allocation51_spill]] %s1219_s23 }
  0x7a   :  { %s1221_s21 = sld [smem:[#allocation6 + $0x1d]] }
  0x7b   :  { %s1223_s10 = sld [smem:[#allocation6 + $0x1e]] }
  0x7c   :  { %s1225_s1 = sld [smem:[#allocation6 + $0x1f]] }
  0x7d   :  { %s1227_s5 = sld [smem:[#allocation6 + $0x20]] }
  0x7e   :  { %s1229_s22 = sld [smem:[#allocation6 + $0x21]] }
  0x7f   :  { %s1231_s3 = sld [smem:[#allocation6 + $0x22]] }
  0x80   :  { %1917 = sst [smem:[#allocation52_spill]] %s1221_s21 }
  0x81   :  { %s1233_s20 = sld [smem:[#allocation6 + $0x23]]  ;;  %v384_v52 = vstv %s1223_s10 }
  0x82   :  { %s1241_s21 = sld [smem:[#allocation6 + $0x28]] }
  0x83   :  { %s1247_s23 = sld [smem:[#allocation6 + $0x32]] }
  0x84   :  { %s1922_s11 = sld [smem:[#allocation16_spill]] }
  0x85   :  { %1918 = sst [smem:[#allocation53_spill]] %s1231_s3 }
  0x86   :  { %s1253_s12 = sld [smem:[#allocation6 + $0x3c]] }
  0x87   :  { %1919 = sst [smem:[#allocation54_spill]] %s1233_s20 }
  0x88   :  { %s1923_s13 = sld [smem:[#allocation17_spill]]  ;;  %v387_v53 = vstv %s1241_s21 }
  0x89   :  { %s1924_s2 = sld [smem:[#allocation18_spill]]  ;;  %v390_v55 = vstv %s1247_s23 }
  0x8a   :  { %s1925_s14 = sld [smem:[#allocation19_spill]]  ;;  %v365_v28 = vstv %s1922_s11 }
  0x8b   :  { %s1926_s15 = sld [smem:[#allocation20_spill]] }
  0x8c   :  { %s1259_s20 = sld [smem:[#allocation6 + $0x46]]  ;;  %v393_v56 = vstv %s1253_s12 }
  0x8d   :  { %v279_v16 = vpop.permute.xlu0 %278  ;;  %s1927_s4 = sld [smem:[#allocation21_spill]] }
  0x8e   :  { %s1928_s16 = sld [smem:[#allocation22_spill]]  ;;  %v283_v25 = vsel %vm1235_vm0, %v279_v16, %v1099_v1  ;;  %v298_v29 = vstv %s1923_s13 }
  0x8f   :  { %s1929_s17 = sld [smem:[#allocation23_spill]]  ;;  %v307_v30 = vstv %s1924_s2  ;;  %v287_v37 = vmul.f32 %v286_v6, %v283_v25  ;;  %v296_v38 = vmul.f32 %v295_v7, %v283_v25  ;;  %v305_v39 = vmul.f32 %v304_v8, %v283_v25 }
  0x90   :  { %s1930_s18 = sld [smem:[#allocation24_spill]]  ;;  %v316_v31 = vstv %s1925_s14  ;;  %v314_v41 = vmul.f32 %v313_v9, %v283_v25  ;;  %v323_v42 = vmul.f32 %v322_v10, %v283_v25  ;;  %v332_v43 = vmul.f32 %v331_v11, %v283_v25 }
  0x91   :  { %s1265_s3 = sld [smem:[#allocation6 + $0x24]]  ;;  %v325_v32 = vstv %s1926_s15  ;;  %v341_v44 = vmul.f32 %v340_v12, %v283_v25  ;;  %v350_v45 = vmul.f32 %v349_v13, %v283_v25  ;;  %v1292_v46 = vmul.f32 %v358_v14, %v283_v25 }
  0x92   :  { %s1932_s25 = sld [smem:[#allocation25_spill]]  ;;  %v1294_v47 = vmul.f32 %v367_v15, %v283_v25  ;;  %v396_v57 = vstv %s1259_s20  ;;  %v414_v25 = vstv %s1205_s24 }
  0x93   :  { %s1273_s26 = sld [smem:[#allocation6 + $0x25]]  ;;  %v334_v33 = vstv %s1927_s4 }
  0x94   :  { %s1279_s27 = sld [smem:[#allocation6 + $0x26]]  ;;  %v343_v34 = vstv %s1928_s16 }
  0x95   :  { %v352_v35 = vstv %s1929_s17  ;;  %s1935_s28 = sld [smem:[#allocation26_spill]]  ;;  %v281_v49 = vpop.permute.xlu0 %280 }
  0x96   :  { %v361_v36 = vstv %s1930_s18  ;;  %s1285_s29 = sld [smem:[#allocation6 + $0x50]]  ;;  %v282_v54 = vsel %vm1235_vm0, %v1092_v0, %v281_v49 }
  0x97   :  { %1931 = sst [smem:[#allocation16_spill]] %s1265_s3  ;;  %v285_v58 = vmul.f32 %v284_v17, %v282_v54  ;;  %v294_v59 = vmul.f32 %v293_v18, %v282_v54  ;;  %v303_v60 = vmul.f32 %v302_v19, %v282_v54  ;;  %v312_v61 = vmul.f32 %v311_v20, %v282_v54 }
  0x98   :  { %s1936_s30 = sld [smem:[#allocation36_spill]]  ;;  %v370_v40 = vstv %s1932_s25  ;;  %v321_v62 = vmul.f32 %v320_v21, %v282_v54  ;;  %v330_v63 = vmul.f32 %v329_v22, %v282_v54  ;;  %v339_v1 = vmul.f32 %v338_v23, %v282_v54 }
  0x99   :  { %1933 = sst [smem:[#allocation17_spill]] %s1273_s26  ;;  %v348_v2 = vmul.f32 %v347_v24, %v282_v54  ;;  %v288_v3 = vadd.f32 %v287_v37, %v285_v58  ;;  %v297_v0 = vadd.f32 %v296_v38, %v294_v59  ;;  %v306_v4 = vadd.f32 %v305_v39, %v303_v60 }
  0x9a   :  { %1934 = sst [smem:[#allocation18_spill]] %s1279_s27  ;;  %v315_v6 = vadd.f32 %v314_v41, %v312_v61  ;;  %v324_v7 = vadd.f32 %v323_v42, %v321_v62  ;;  %v333_v8 = vadd.f32 %v332_v43, %v330_v63  ;;  %v342_v9 = vadd.f32 %v341_v44, %v339_v1 }
  0x9b   :  { %s1288_s8 = sld [smem:[#allocation6 + $0x27]]  ;;  %v374_v48 = vstv %s1935_s28  ;;  %v290_v11 = vadd.f32 %v289_v26, %v288_v3  ;;  %v299_v12 = vadd.f32 %v298_v29, %v297_v0  ;;  %v308_v13 = vadd.f32 %v307_v30, %v306_v4 }
  0x9c   :  { %s1290_s0 = sld [smem:[#allocation6 + $0x29]]  ;;  %v399_v10 = vstv %s1285_s29  ;;  %v351_v14 = vadd.f32 %v350_v45, %v348_v2  ;;  %v317_v15 = vadd.f32 %v316_v31, %v315_v6  ;;  %v326_v16 = vadd.f32 %v325_v32, %v324_v7 }
  0x9d   :  { %s1297_s19 = sld [smem:[#allocation6 + $0x2a]]  ;;  %v335_v17 = vadd.f32 %v334_v33, %v333_v8  ;;  %v291_v19 = vmul.f32 0.2, %v290_v11  ;;  %v300_v20 = vmul.f32 0.2, %v299_v12  ;;  %v357_v21 = vmul.f32 %v356_v27, %v282_v54 }
  0x9e   :  { %v378_v50 = vstv %s1936_s30  ;;  %s1303_s13 = sld [smem:[#allocation6 + $0x2b]]  ;;  %v366_v22 = vmul.f32 %v365_v28, %v282_v54  ;;  %v309_v23 = vmul.f32 0.2, %v308_v13  ;;  %v417_v26 = vstv %s1225_s1 }
  0x9f   :  { %s1311_s2 = sld [smem:[#allocation6 + $0x33]]  ;;  %v1338_v29 = vmax.f32 %v290_v11, %v291_v19  ;;  %v344_v30 = vadd.f32 %v343_v34, %v342_v9  ;;  %v353_v31 = vadd.f32 %v352_v35, %v351_v14  ;;  %v1347_v28 = vmax.f32 %v299_v12, %v300_v20 }
  0xa0   :  { %s1313_s14 = sld [smem:[#allocation6 + $0x3d]]  ;;  %v318_v32 = vmul.f32 0.2, %v317_v15  ;;  %v327_v38 = vmul.f32 0.2, %v326_v16  ;;  %v360_v34 = vadd.f32 %v1292_v46, %v357_v21  ;;  %v369_v35 = vadd.f32 %v1294_v47, %v366_v22 }
  0xa1   :  { %1937 = sst [smem:[#allocation19_spill]] %s1288_s8  ;;  %v336_v39 = vmul.f32 0.2, %v335_v17  ;;  %v1357_v41 = vmax.f32 %v308_v13, %v309_v23  ;;  %v375_v42 = vmul.f32 %v374_v48, %v1338_v29  ;;  %v345_v45 = vmul.f32 0.2, %v344_v30 }
  0xa2   :  { %s1315_s15 = sld [smem:[#allocation6 + $0x47]]  ;;  %v420_v27 = vstv %s1290_s0  ;;  %v354_v49 = vmul.f32 0.2, %v353_v31  ;;  %v362_v46 = vadd.f32 %v361_v36, %v360_v34  ;;  %v1371_v54 = vmax.f32 %v317_v15, %v318_v32 }
  0xa3   :  { %s1939_s4 = sld [smem:[#allocation27_spill]]  ;;  %v379_v48 = vmul.f32 %v378_v50, %v1347_v28  ;;  %v1379_v60 = vmax.f32 %v326_v16, %v327_v38  ;;  %v1381_v61 = vmax.f32 %v335_v17, %v336_v39  ;;  %v371_v36 = vadd.f32 %v370_v40, %v369_v35 }
  0xa4   :  { %1938 = sst [smem:[#allocation20_spill]] %s1303_s13  ;;  %v382_v1 = vmul.f32 %v381_v51, %v1357_v41  ;;  %v1395_v3 = vmax.f32 %v344_v30, %v345_v45  ;;  %v1397_v0 = vmax.f32 %v353_v31, %v354_v49  ;;  %v363_v40 = vmul.f32 0.2, %v362_v46 }
  0xa5   :  { %s1317_s8 = sld [smem:[#allocation6 + $0x51]]  ;;  %v423_v33 = vstv %s1311_s2  ;;  %v447_v4 = vstv %s1207_s7  ;;  %v385_v51 = vmul.f32 %v384_v52, %v1371_v54  ;;  %v372_v9 = vmul.f32 0.2, %v371_v36 }
  0xa6   :  { %s1320_s27 = sld [smem:[#allocation6 + $0x2c]]  ;;  %v426_v37 = vstv %s1313_s14  ;;  %v388_v11 = vmul.f32 %v387_v53, %v1379_v60  ;;  %v391_v52 = vmul.f32 %v390_v55, %v1381_v61  ;;  %v415_v16 = vmul.f32 %v414_v25, %v1357_v41 }
  0xa7   :  { %s1941_s26 = sld [smem:[#allocation37_spill]]  ;;  %v1421_v17 = vmax.f32 %v362_v46, %v363_v40  ;;  %v394_v53 = vmul.f32 %v393_v56, %v1395_v3  ;;  %v397_v20 = vmul.f32 %v396_v57, %v1397_v0  ;;  %v418_v22 = vmul.f32 %v417_v26, %v1371_v54 }
  0xa8   :  { %s1322_s3 = sld [smem:[#allocation6 + $0x2d]]  ;;  %v429_v43 = vstv %s1315_s15  ;;  %v1438_v56 = vmax.f32 %v371_v36, %v372_v9  ;;  %v450_v25 = vstv %s1227_s5  ;;  %v421_v57 = vmul.f32 %v420_v27, %v1379_v60 }
  0xa9   :  { %v407_v18 = vstv %s1939_s4  ;;  %s1325_s13 = sld [smem:[#allocation7]]  ;;  %v424_v26 = vmul.f32 %v423_v33, %v1381_v61  ;;  %v400_v32 = vmul.f32 %v399_v10, %v1421_v17  ;;  %v427_v38 = vmul.f32 %v426_v37, %v1395_v3 }
  0xaa   :  { %s1345_s9 = sld [smem:[#allocation6 + $0x5a]]  ;;  %v408_v50 = vmul.f32 %v407_v18, %v1338_v29  ;;  %v448_v34 = vmul.f32 %v447_v4, %v1357_v41  ;;  %v453_v33 = vstv %s1297_s19 }
  0xab   :  { %s1351_s24 = sld [smem:[#allocation6 + $0x5b]]  ;;  %v432_v44 = vstv %s1317_s8  ;;  %v454_v36 = vmul.f32 %v453_v33, %v1379_v60 }
  0xac   :  { %1940 = sst [smem:[#allocation21_spill]] %s1320_s27 }
  0xad   :  { %s1331_s27 = sld [smem:[#allocation7 + $0x1]]  ;;  %v411_v24 = vstv %s1941_s26 }
  0xae   :  { %1942 = sst [smem:[#allocation22_spill]] %s1322_s3  ;;  %v412_v8 = vmul.f32 %v411_v24, %v1347_v28 }
  0xaf   :  { %s1336_s3 = sld [smem:[#allocation6 + $0x2e]]  ;;  %v376_v47 = vstv %s1325_s13 }
  0xb0   :  { %s1943_s11 = sld [smem:[#allocation28_spill]]  ;;  %v377_v58 = vadd.f32 %v376_v47, %v375_v42  ;;  %v402_v12 = vstv %s1345_s9  ;;  %v451_v42 = vmul.f32 %v450_v25, %v1371_v54 }
  0xb1   :  { %s1355_s16 = sld [smem:[#allocation6 + $0x2f]]  ;;  %v435_v13 = vstv %s1351_s24 }
  0xb2   :  { %s1944_s17 = sld [smem:[#allocation38_spill]]  ;;  %v380_v63 = vadd.f32 %v379_v48, %v377_v58 }
  0xb3   :  { %s1364_s26 = sld [smem:[#allocation7 + $0x2]]  ;;  %v409_v2 = vstv %s1331_s27 }
  0xb4   :  { %s1369_s4 = sld [smem:[#allocation6 + $0x30]]  ;;  %v383_v6 = vadd.f32 %v382_v1, %v380_v63  ;;  %v410_v7 = vadd.f32 %v409_v2, %v408_v50  ;;  %v430_v50 = vmul.f32 %v429_v43, %v1397_v0 }
  0xb5   :  { %s1377_s28 = sld [smem:[#allocation6 + $0x31]] }
  0xb6   :  { %v440_v59 = vstv %s1943_s11  ;;  %s1386_s18 = sld [smem:[#allocation6 + $0x34]]  ;;  %v386_v14 = vadd.f32 %v385_v51, %v383_v6  ;;  %v413_v15 = vadd.f32 %v412_v8, %v410_v7  ;;  %v483_v7 = vstv %s1229_s22 }
  0xb7   :  { %s1393_s30 = sld [smem:[#allocation6 + $0x35]]  ;;  %v441_v18 = vmul.f32 %v440_v59, %v1338_v29 }
  0xb8   :  { %v444_v62 = vstv %s1944_s17  ;;  %s1400_s25 = sld [smem:[#allocation6 + $0x36]]  ;;  %v389_v55 = vadd.f32 %v388_v11, %v386_v14  ;;  %v416_v21 = vadd.f32 %v415_v16, %v413_v15 }
  0xb9   :  { %s1406_s6 = sld [smem:[#allocation7 + $0x3]]  ;;  %v442_v19 = vstv %s1364_s26  ;;  %v445_v24 = vmul.f32 %v444_v62, %v1347_v28 }
  0xba   :  { %s1413_s7 = sld [smem:[#allocation6 + $0x3e]]  ;;  %v443_v23 = vadd.f32 %v442_v19, %v441_v18  ;;  %v392_v30 = vadd.f32 %v391_v52, %v389_v55  ;;  %v419_v31 = vadd.f32 %v418_v22, %v416_v21  ;;  %v433_v18 = vmul.f32 %v432_v44, %v1421_v17 }
  0xbb   :  { %s1419_s10 = sld [smem:[#allocation6 + $0x37]]  ;;  %v484_v55 = vmul.f32 %v483_v7, %v1371_v54 }
  0xbc   :  { %s1428_s21 = sld [smem:[#allocation6 + $0x38]]  ;;  %v446_v39 = vadd.f32 %v445_v24, %v443_v23  ;;  %v395_v35 = vadd.f32 %v394_v53, %v392_v30  ;;  %v422_v27 = vadd.f32 %v421_v57, %v419_v31  ;;  %v456_v10 = vstv %s1386_s18 }
  0xbd   :  { %s1436_s23 = sld [smem:[#allocation6 + $0x39]]  ;;  %v457_v6 = vmul.f32 %v456_v10, %v1381_v61  ;;  %v403_v53 = vmul.f32 %v402_v12, %v1438_v56  ;;  %v489_v23 = vstv %s1393_s30 }
  0xbe   :  { %s1442_s12 = sld [smem:[#allocation6 + $0x48]]  ;;  %v449_v45 = vadd.f32 %v448_v34, %v446_v39  ;;  %v398_v46 = vadd.f32 %v397_v20, %v395_v35  ;;  %v425_v47 = vadd.f32 %v424_v26, %v422_v27  ;;  %v436_v20 = vmul.f32 %v435_v13, %v1438_v56 }
  0xbf   :  { %s1945_s20 = sld [smem:[#allocation29_spill]]  ;;  %v475_v37 = vstv %s1406_s6  ;;  %v522_v7 = vstv %s1400_s25 }
  0xc0   :  { %s1450_s1 = sld [smem:[#allocation6 + $0x52]]  ;;  %v459_v58 = vstv %s1413_s7  ;;  %v452_v59 = vadd.f32 %v451_v42, %v449_v45  ;;  %v428_v1 = vadd.f32 %v427_v38, %v425_v47  ;;  %v401_v8 = vadd.f32 %v400_v32, %v398_v46 }
  0xc1   :  { %s1459_s5 = sld [smem:[#allocation6 + $0x3a]]  ;;  %v460_v51 = vmul.f32 %v459_v58, %v1395_v3  ;;  %v490_v38 = vmul.f32 %v489_v23, %v1381_v61 }
  0xc2   :  { %s1946_s27 = sld [smem:[#allocation39_spill]]  ;;  %v455_v4 = vadd.f32 %v454_v36, %v452_v59  ;;  %v431_v14 = vadd.f32 %v430_v50, %v428_v1  ;;  %v1514_v12 = vadd.f32 %v403_v53, %v401_v8 }
  0xc3   :  { %s1947_s0 = sld [smem:[#allocation46_spill]] }
  0xc4   :  { %s1463_s13 = sld [smem:[#allocation6 + $0x3b]]  ;;  %v462_v43 = vstv %s1442_s12  ;;  %v458_v52 = vadd.f32 %v457_v6, %v455_v4  ;;  %v434_v13 = vadd.f32 %v433_v18, %v431_v14  ;;  %v1536_v33 = vmul.f32 0.2, %v1514_v12 }
  0xc5   :  { %v473_v49 = vstv %s1945_s20  ;;  %s1468_s29 = sld [smem:[#allocation6 + $0x3f]]  ;;  %v463_v22 = vmul.f32 %v462_v43, %v1397_v0 }
  0xc6   :  { %v474_v48 = vmul.f32 %v473_v49, %v1338_v29  ;;  %s1472_s2 = sld [smem:[#allocation7 + $0x4]]  ;;  %v465_v15 = vstv %s1450_s1  ;;  %v461_v21 = vadd.f32 %v460_v51, %v458_v52  ;;  %v1546_v58 = vadd.f32 %v436_v20, %v434_v13 }
  0xc7   :  { %s1477_s19 = sld [smem:[#allocation6 + $0x49]]  ;;  %v466_v44 = vmul.f32 %v465_v15, %v1421_v17  ;;  %v406_v50 = vmax.f32 %v1514_v12, %v1536_v33 }
  0xc8   :  { %v477_v62 = vstv %s1946_s27  ;;  %v476_v2 = vadd.f32 %v475_v37, %v474_v48  ;;  %s1948_s14 = sld [smem:[#allocation20_spill]]  ;;  %v464_v26 = vadd.f32 %v463_v22, %v461_v21  ;;  %v1568_v43 = vmul.f32 0.2, %v1546_v58 }
  0xc9   :  { %v480_v63 = vstv %s1947_s0  ;;  %v478_v40 = vmul.f32 %v477_v62, %v1347_v28  ;;  %s1483_s11 = sld [smem:[#allocation6 + $0x5c]] }
  0xca   :  { %s1488_s17 = sld [smem:[#allocation6 + $0x40]]  ;;  %v481_v11 = vmul.f32 %v480_v63, %v1357_v41  ;;  %v467_v48 = vadd.f32 %v466_v44, %v464_v26 }
  0xcb   :  { %v479_v9 = vadd.f32 %v478_v40, %v476_v2  ;;  %s1492_s15 = sld [smem:[#allocation6 + $0x53]]  ;;  %v492_v30 = vstv %s1468_s29 }
  0xcc   :  { %s1496_s26 = sld [smem:[#allocation6 + $0x41]]  ;;  %v508_v57 = vstv %s1472_s2  ;;  %v493_v37 = vmul.f32 %v492_v30, %v1395_v3 }
  0xcd   :  { %s1949_s22 = sld [smem:[#allocation30_spill]]  ;;  %v482_v19 = vadd.f32 %v481_v11, %v479_v9  ;;  %v495_v35 = vstv %s1477_s19 }
  0xce   :  { %v486_v16 = vstv %s1948_s14  ;;  %s1505_s18 = sld [smem:[#allocation6 + $0x42]]  ;;  %v496_v63 = vmul.f32 %v495_v35, %v1397_v0 }
  0xcf   :  { %s1512_s9 = sld [smem:[#allocation6 + $0x43]]  ;;  %v485_v24 = vadd.f32 %v484_v55, %v482_v19  ;;  %v487_v25 = vmul.f32 %v486_v16, %v1379_v60  ;;  %v468_v34 = vstv %s1483_s11  ;;  %v523_v55 = vmul.f32 %v522_v7, %v1381_v61 }
  0xd0   :  { %s1950_s8 = sld [smem:[#allocation40_spill]]  ;;  %v469_v62 = vmul.f32 %v468_v34, %v1438_v56  ;;  %v525_v52 = vstv %s1488_s17 }
  0xd1   :  { %s1951_s6 = sld [smem:[#allocation47_spill]]  ;;  %v488_v32 = vadd.f32 %v487_v25, %v485_v24  ;;  %v498_v46 = vstv %s1492_s15  ;;  %v526_v25 = vmul.f32 %v525_v52, %v1395_v3 }
  0xd2   :  { %s1518_s7 = sld [smem:[#allocation6 + $0x5d]]  ;;  %v499_v6 = vmul.f32 %v498_v46, %v1421_v17  ;;  %v1570_v9 = vadd.f32 %v469_v62, %v467_v48  ;;  %v555_v46 = vstv %s1419_s10 }
  0xd3   :  { %v506_v31 = vstv %s1949_s22  ;;  %s1523_s24 = sld [smem:[#allocation6 + $0x44]]  ;;  %v491_v45 = vadd.f32 %v490_v38, %v488_v32 }
  0xd4   :  { %s1952_s30 = sld [smem:[#allocation53_spill]]  ;;  %v507_v39 = vmul.f32 %v506_v31, %v1338_v29  ;;  %v439_v31 = vmax.f32 %v1546_v58, %v1568_v43  ;;  %v1602_v38 = vmul.f32 0.2, %v1570_v9 }
  0xd5   :  { %s1527_s12 = sld [smem:[#allocation7 + $0x5]]  ;;  %v494_v2 = vadd.f32 %v493_v37, %v491_v45 }
  0xd6   :  { %v510_v27 = vstv %s1950_s8  ;;  %s1533_s20 = sld [smem:[#allocation6 + $0x45]]  ;;  %v509_v10 = vadd.f32 %v508_v57, %v507_v39 }
  0xd7   :  { %v513_v42 = vstv %s1951_s6  ;;  %s1953_s1 = sld [smem:[#allocation21_spill]]  ;;  %v511_v49 = vmul.f32 %v510_v27, %v1347_v28  ;;  %v497_v18 = vadd.f32 %v496_v63, %v494_v2 }
  0xd8   :  { %s1539_s27 = sld [smem:[#allocation6 + $0x4a]]  ;;  %v514_v36 = vmul.f32 %v513_v42, %v1357_v41  ;;  %v501_v51 = vstv %s1518_s7 }
  0xd9   :  { %s1544_s0 = sld [smem:[#allocation6 + $0x54]]  ;;  %v512_v59 = vadd.f32 %v511_v49, %v509_v10  ;;  %v502_v21 = vmul.f32 %v501_v51, %v1438_v56  ;;  %v500_v39 = vadd.f32 %v499_v6, %v497_v18  ;;  %v556_v51 = vmul.f32 %v555_v46, %v1381_v61 }
  0xda   :  { %v516_v47 = vstv %s1952_s30  ;;  %s1954_s29 = sld [smem:[#allocation31_spill]]  ;;  %v585_v18 = vstv %s1336_s3 }
  0xdb   :  { %s1549_s2 = sld [smem:[#allocation6 + $0x4b]]  ;;  %v515_v40 = vadd.f32 %v514_v36, %v512_v59  ;;  %v517_v4 = vmul.f32 %v516_v47, %v1371_v54  ;;  %v541_v16 = vstv %s1527_s12  ;;  %v1622_v63 = vadd.f32 %v502_v21, %v500_v39 }
  0xdc   :  { %s1554_s19 = sld [smem:[#allocation6 + $0x4c]] }
  0xdd   :  { %v519_v1 = vstv %s1953_s1  ;;  %s1955_s14 = sld [smem:[#allocation41_spill]]  ;;  %v518_v11 = vadd.f32 %v517_v4, %v515_v40 }
  0xde   :  { %s1559_s11 = sld [smem:[#allocation6 + $0x4d]]  ;;  %v520_v14 = vmul.f32 %v519_v1, %v1379_v60  ;;  %v528_v22 = vstv %s1539_s27  ;;  %v558_v1 = vstv %s1496_s26 }
  0xdf   :  { %s1956_s15 = sld [smem:[#allocation48_spill]]  ;;  %v531_v13 = vstv %s1544_s0  ;;  %v529_v35 = vmul.f32 %v528_v22, %v1397_v0 }
  0xe0   :  { %v539_v8 = vstv %s1954_s29  ;;  %s1565_s22 = sld [smem:[#allocation6 + $0x4e]]  ;;  %v521_v19 = vadd.f32 %v520_v14, %v518_v11  ;;  %v532_v27 = vmul.f32 %v531_v13, %v1421_v17 }
  0xe1   :  { %s1573_s8 = sld [smem:[#allocation7 + $0x6]]  ;;  %v540_v15 = vmul.f32 %v539_v8, %v1338_v29  ;;  %v561_v11 = vstv %s1549_s2 }
  0xe2   :  { %s1957_s25 = sld [smem:[#allocation54_spill]]  ;;  %v524_v24 = vadd.f32 %v523_v55, %v521_v19  ;;  %v1644_v19 = vmul.f32 0.2, %v1622_v63 }
  0xe3   :  { %v543_v53 = vstv %s1955_s14  ;;  %s1579_s6 = sld [smem:[#allocation6 + $0x4f]]  ;;  %v542_v23 = vadd.f32 %v541_v16, %v540_v15  ;;  %v472_v15 = vmax.f32 %v1570_v9, %v1602_v38 }
  0xe4   :  { %s1959_s7 = sld [smem:[#allocation22_spill]]  ;;  %v544_v44 = vmul.f32 %v543_v53, %v1347_v28  ;;  %v527_v34 = vadd.f32 %v526_v25, %v524_v24  ;;  %v559_v53 = vmul.f32 %v558_v1, %v1395_v3 }
  0xe5   :  { %v546_v20 = vstv %s1956_s15  ;;  %s1583_s30 = sld [smem:[#allocation6 + $0x5e]] }
  0xe6   :  { %s1588_s17 = sld [smem:[#allocation6 + $0x55]]  ;;  %v545_v57 = vadd.f32 %v544_v44, %v542_v23  ;;  %v547_v26 = vmul.f32 %v546_v20, %v1357_v41  ;;  %v530_v49 = vadd.f32 %v529_v35, %v527_v34  ;;  %v562_v23 = vmul.f32 %v561_v11, %v1397_v0 }
  0xe7   :  { %s1960_s12 = sld [smem:[#allocation32_spill]]  ;;  %v574_v59 = vstv %s1573_s8  ;;  %v588_v44 = vstv %s1428_s21 }
  0xe8   :  { %v549_v30 = vstv %s1957_s25  ;;  %s1593_s1 = sld [smem:[#allocation6 + $0x56]]  ;;  %v548_v42 = vadd.f32 %v547_v26, %v545_v57  ;;  %v533_v8 = vadd.f32 %v532_v27, %v530_v49  ;;  %v586_v57 = vmul.f32 %v585_v18, %v1379_v60 }
  0xe9   :  { %1958 = sst [smem:[#allocation23_spill]] %s1579_s6  ;;  %v550_v45 = vmul.f32 %v549_v30, %v1371_v54  ;;  %v594_v49 = vstv %s1554_s19 }
  0xea   :  { %v552_v32 = vstv %s1959_s7  ;;  %s1599_s27 = sld [smem:[#allocation6 + $0x57]] }
  0xeb   :  { %s1961_s0 = sld [smem:[#allocation42_spill]]  ;;  %v553_v37 = vmul.f32 %v552_v32, %v1379_v60  ;;  %v551_v48 = vadd.f32 %v550_v45, %v548_v42  ;;  %v534_v4 = vstv %s1583_s30  ;;  %v589_v42 = vmul.f32 %v588_v44, %v1381_v61 }
  0xec   :  { %s1962_s29 = sld [smem:[#allocation49_spill]]  ;;  %v535_v55 = vmul.f32 %v534_v4, %v1438_v56  ;;  %v564_v13 = vstv %s1588_s17 }
  0xed   :  { %s1605_s14 = sld [smem:[#allocation6 + $0x58]]  ;;  %v572_v10 = vstv %s1960_s12  ;;  %v554_v6 = vadd.f32 %v553_v37, %v551_v48 }
  0xee   :  { %s1610_s15 = sld [smem:[#allocation6 + $0x5f]]  ;;  %v573_v47 = vmul.f32 %v572_v10, %v1338_v29  ;;  %v1655_v25 = vadd.f32 %v535_v55, %v533_v8  ;;  %v591_v10 = vstv %s1505_s18  ;;  %v597_v8 = vstv %s1593_s1 }
  0xef   :  { %s1963_s25 = sld [smem:[#allocation16_spill]]  ;;  %v557_v16 = vadd.f32 %v556_v51, %v554_v6  ;;  %v592_v6 = vmul.f32 %v591_v10, %v1395_v3  ;;  %v595_v51 = vmul.f32 %v594_v49, %v1397_v0 }
  0xf0   :  { %s1615_s7 = sld [smem:[#allocation7 + $0x7]]  ;;  %v575_v2 = vadd.f32 %v574_v59, %v573_v47  ;;  %v505_v47 = vmax.f32 %v1622_v63, %v1644_v19  ;;  %v1679_v48 = vmul.f32 0.2, %v1655_v25  ;;  %v565_v59 = vmul.f32 %v564_v13, %v1421_v17 }
  0xf1   :  { %v576_v36 = vstv %s1961_s0  ;;  %s1620_s6 = sld [smem:[#allocation6 + $0x59]]  ;;  %v560_v22 = vadd.f32 %v559_v53, %v557_v16  ;;  %v621_v53 = vstv %s1436_s23 }
  0xf2   :  { %v579_v62 = vstv %s1962_s29  ;;  %v577_v40 = vmul.f32 %v576_v36, %v1347_v28  ;;  %s1626_s10 = sld [smem:[#allocation6 + $0x60]]  ;;  %v538_v16 = vmax.f32 %v1655_v25, %v1679_v48 }
  0xf3   :  { %s1631_s12 = sld [smem:[#allocation6 + $0x61]]  ;;  %v580_v52 = vmul.f32 %v579_v62, %v1357_v41  ;;  %v563_v35 = vadd.f32 %v562_v23, %v560_v22 }
  0xf4   :  { %v578_v14 = vadd.f32 %v577_v40, %v575_v2  ;;  %s1965_s8 = sld [smem:[#allocation33_spill]]  ;;  %v567_v26 = vstv %s1610_s15 }
  0xf5   :  { %v582_v7 = vstv %s1963_s25  ;;  %s1635_s26 = sld [smem:[#allocation6 + $0x62]]  ;;  %v568_v62 = vmul.f32 %v567_v26, %v1438_v56  ;;  %v566_v4 = vadd.f32 %v565_v59, %v563_v35  ;;  %v622_v26 = vmul.f32 %v621_v53, %v1381_v61 }
  0xf6   :  { %s1641_s30 = sld [smem:[#allocation7 + $0x8]]  ;;  %v581_v20 = vadd.f32 %v580_v52, %v578_v14  ;;  %v583_v21 = vmul.f32 %v582_v7, %v1371_v54  ;;  %v607_v39 = vstv %s1615_s7  ;;  %v618_v7 = vstv %s1355_s16 }
  0xf7   :  { %1964 = sst [smem:[#allocation24_spill]] %s1620_s6  ;;  %v619_v22 = vmul.f32 %v618_v7, %v1379_v60  ;;  %v1710_v44 = vadd.f32 %v568_v62, %v566_v4  ;;  %v627_v35 = vstv %s1559_s11  ;;  %v651_v62 = vstv %s1369_s4 }
  0xf8   :  { %s1966_s2 = sld [smem:[#allocation43_spill]]  ;;  %v584_v30 = vadd.f32 %v583_v21, %v581_v20  ;;  %v600_v11 = vstv %s1626_s10  ;;  %v654_v7 = vstv %s1459_s5 }
  0xf9   :  { %s1648_s0 = sld [smem:[#allocation9 + $0x1]]  ;;  %v601_v59 = vmul.f32 %v600_v11, %v1438_v56 }
  0xfa   :  { %s1967_s3 = sld [smem:[#allocation50_spill]]  ;;  %v605_v24 = vstv %s1965_s8  ;;  %v587_v27 = vadd.f32 %v586_v57, %v584_v30 }
  0xfb   :  { %s1653_s29 = sld [smem:[#allocation9]]  ;;  %v606_v32 = vmul.f32 %v605_v24, %v1338_v29  ;;  %v624_v24 = vstv %s1512_s9 }
  0xfc   :  { %s1659_s25 = sld [smem:[#allocation9 + $0x3]]  ;;  %v590_v1 = vadd.f32 %v589_v42, %v587_v27  ;;  %v640_v55 = vstv %s1641_s30  ;;  %v630_v27 = vstv %s1599_s27 }
  0xfd   :  { %s1968_s6 = sld [smem:[#allocation17_spill]]  ;;  %v608_v37 = vadd.f32 %v607_v39, %v606_v32 }
  0xfe   :  { %v609_v34 = vstv %s1966_s2  ;;  %s1665_s21 = sld [smem:[#allocation9 + $0x2]]  ;;  %v593_v20 = vadd.f32 %v592_v6, %v590_v1  ;;  %v628_v1 = vmul.f32 %v627_v35, %v1397_v0 }
  0xff   :  { %s1669_s8 = sld [smem:[#allocation6 + $0x63]]  ;;  %v610_v46 = vmul.f32 %v609_v34, %v1347_v28  ;;  %v598_v34 = vmul.f32 %v597_v8, %v1421_v17 }
 0x100   :  { %v612_v45 = vstv %s1967_s3  ;;  %s1674_s17 = sld [smem:[#allocation7 + $0x9]] }
 0x101   :  { %s1683_s18 = sld [smem:[#allocation9 + $0x5]]  ;;  %v611_v2 = vadd.f32 %v610_v46, %v608_v37  ;;  %v613_v40 = vmul.f32 %v612_v45, %v1357_v41  ;;  %v596_v45 = vadd.f32 %v595_v51, %v593_v20  ;;  %v1731_v46 = vmul.f32 0.2, %v1710_v44 }
 0x102   :  { %s1969_s19 = sld [smem:[#allocation34_spill]]  ;;  %v633_v51 = vstv %s1631_s12 }
 0x103   :  { %v615_v36 = vstv %s1968_s6  ;;  %s1687_s15 = sld [smem:[#allocation9 + $0x4]]  ;;  %v614_v14 = vadd.f32 %v613_v40, %v611_v2  ;;  %v631_v2 = vmul.f32 %v630_v27, %v1421_v17  ;;  %v599_v11 = vadd.f32 %v598_v34, %v596_v45 }
 0x104   :  { %s1692_s6 = sld [smem:[#allocation9 + $0x7]]  ;;  %v616_v52 = vmul.f32 %v615_v36, %v1371_v54  ;;  %v625_v36 = vmul.f32 %v624_v24, %v1395_v3  ;;  %v634_v27 = vmul.f32 %v633_v51, %v1438_v56  ;;  %v684_v45 = vstv %s1377_s28 }
 0x105   :  { %s1970_s7 = sld [smem:[#allocation44_spill]]  ;;  %v685_v51 = vmul.f32 %v684_v45, %v1379_v60  ;;  %v571_v43 = vmax.f32 %v1710_v44, %v1731_v46 }
 0x106   :  { %s1971_s2 = sld [smem:[#allocation51_spill]]  ;;  %v617_v21 = vadd.f32 %v616_v52, %v614_v14  ;;  %v652_v52 = vmul.f32 %v651_v62, %v1379_v60  ;;  %v687_v62 = vstv %s1463_s13 }
 0x107   :  { %s239_s3 = ssub.f32 %s1648_s0, %s1653_s29 }
 0x108   :  { %v638_v18 = vstv %s1969_s19  ;;  %s1704_s16 = sld [smem:[#allocation9 + $0x6]]  ;;  %v620_v57 = vadd.f32 %v619_v22, %v617_v21 }
 0x109   :  { %s1972_s1 = sld [smem:[#allocation18_spill]]  ;;  %v639_v23 = vmul.f32 %v638_v18, %v1338_v29  ;;  %v657_v18 = vstv %s1523_s24 }
 0x10a   :  { %s1715_s23 = sld [smem:[#allocation9 + $0x9]]  ;;  %v623_v10 = vadd.f32 %v622_v26, %v620_v57  ;;  %v663_v57 = vstv %s1605_s14 }
 0x10b   :  { %v642_v13 = vstv %s1970_s7  ;;  %v641_v32 = vadd.f32 %v640_v55, %v639_v23  ;;  %s1719_s30 = sld [smem:[#allocation9 + $0x8]]  ;;  %v673_v55 = vstv %s1674_s17  ;;  %v655_v23 = vmul.f32 %v654_v7, %v1381_v61 }
 0x10c   :  { %v645_v30 = vstv %s1971_s2  ;;  %v643_v39 = vmul.f32 %v642_v13, %v1347_v28  ;;  %s1725_s9 = sld [smem:[#allocation10 + $0x1]]  ;;  %v626_v6 = vadd.f32 %v625_v36, %v623_v10 }
 0x10d   :  { %s1973_s19 = sld [smem:[#allocation35_spill]]  ;;  %v646_v37 = vmul.f32 %v645_v30, %v1357_v41  ;;  %v660_v30 = vstv %s1565_s22 }
 0x10e   :  { %v644_v49 = vadd.f32 %v643_v39, %v641_v32  ;;  %s1728_s7 = sld [smem:[#allocation10]]  ;;  %v658_v39 = vmul.f32 %v657_v18, %v1395_v3 }
 0x10f   :  { %v648_v42 = vstv %s1972_s1  ;;  %s1974_s27 = sld [smem:[#allocation45_spill]] }
 0x110   :  { %v647_v40 = vadd.f32 %v646_v37, %v644_v49  ;;  %s1975_s2 = sld [smem:[#allocation52_spill]]  ;;  %v649_v4 = vmul.f32 %v648_v42, %v1371_v54  ;;  %v666_v42 = vstv %s1635_s26  ;;  %v661_v49 = vmul.f32 %v660_v30, %v1397_v0 }
 0x111   :  { %s1741_s1 = sld [smem:[#allocation9 + $0xb]] }
 0x112   :  { %s1746_s4 = sld [smem:[#allocation9 + $0xa]]  ;;  %v650_v14 = vadd.f32 %v649_v4, %v647_v40  ;;  %v667_v4 = vmul.f32 %v666_v42, %v1438_v56 }
 0x113   :  { %v671_v8 = vstv %s1973_s19  ;;  %s1976_s11 = sld [smem:[#allocation19_spill]] }
 0x114   :  { %v672_v53 = vmul.f32 %v671_v8, %v1338_v29  ;;  %s248_s10 = ssub.f32 %s1692_s6, %s1704_s16  ;;  %v653_v22 = vadd.f32 %v652_v52, %v650_v14  ;;  %v629_v29 = vadd.f32 %v628_v1, %v626_v6  ;;  %v704_v1 = vstv %s239_s3  ;;  %s1981_s6 = smov 1  }
 0x115   :  { %v675_v20 = vstv %s1974_s27  ;;  %s1756_s5 = sld [smem:[#allocation9 + $0xd]]  ;;  %v688_v52 = vmul.f32 %v687_v62, %v1381_v61  ;;  %s1982_s16 = smov 127  }
 0x116   :  { %v678_v21 = vstv %s1975_s2  ;;  %v674_v24 = vadd.f32 %v673_v55, %v672_v53  ;;  %v676_v13 = vmul.f32 %v675_v20, %v1347_v28  ;;  %s1760_s12 = sld [smem:[#allocation9 + $0xc]]  ;;  %v656_v32 = vadd.f32 %v655_v23, %v653_v22 }
 0x117   :  { %s251_s24 = ssub.f32 %s1715_s23, %s1719_s30  ;;  %v679_v35 = vmul.f32 %v678_v21, %v1357_v41  ;;  %v1771_v28 = vadd.f32 %v601_v59, %v599_v11  ;;  %v632_v36 = vadd.f32 %v631_v2, %v629_v29  ;;  %v664_v59 = vmul.f32 %v663_v57, %v1421_v17 }
 0x118   :  { %v677_v34 = vadd.f32 %v676_v13, %v674_v24  ;;  %s269_s17 = ssub.f32 %s1725_s9, %s1728_s7  ;;  %v659_v10 = vadd.f32 %v658_v39, %v656_v32  ;;  %v705_v2 = vmul.f32 %v704_v1, %v406_v50  ;;  %v714_v20 = vstv %s248_s10 }
 0x119   :  { %v681_v26 = vstv %s1976_s11  ;;  %s1776_s22 = sld [smem:[#allocation9 + $0xf]]  ;;  %v635_v12 = vadd.f32 %v634_v27, %v632_v36  ;;  %v603_v61 = vmul.f32 0.2, %v1771_v28  ;;  %v717_v24 = vstv %s251_s24 }
 0x11a   :  { %v680_v37 = vadd.f32 %v679_v35, %v677_v34  ;;  %v682_v41 = vmul.f32 %v681_v26, %v1371_v54  ;;  %s1780_s14 = sld [smem:[#allocation9 + $0xe]]  ;;  %v662_v40 = vadd.f32 %v661_v49, %v659_v10  ;;  %v690_v54 = vstv %s1533_s20 }
 0x11b   :  { %s254_s28 = ssub.f32 %s1741_s1, %s1746_s4  ;;  %v706_v7 = vstv %s269_s17  ;;  %v691_v55 = vmul.f32 %v690_v54, %v1395_v3  ;;  %v636_v13 = vmul.f32 0.2, %v635_v12  ;;  %v699_v29 = vstv %s1669_s8 }
 0x11c   :  { %s1977_s26 = sld [smem:[#allocation23_spill]]  ;;  %v683_v6 = vadd.f32 %v682_v41, %v680_v37  ;;  %v665_v11 = vadd.f32 %v664_v59, %v662_v40  ;;  %v707_v50 = vadd.f32 %v706_v7, %v705_v2  ;;  %v715_v57 = vmul.f32 %v714_v20, %v505_v47 }
 0x11d   :  { %s1791_s9 = sld [smem:[#allocation9 + $0x11]]  ;;  %v604_v44 = vmax.f32 %v1771_v28, %v603_v61  ;;  %v718_v26 = vmul.f32 %v717_v24, %v538_v16  ;;  %v700_v63 = vmul.f32 %v699_v29, %v1438_v56  ;;  %v637_v47 = vmax.f32 %v635_v12, %v636_v13 }
 0x11e   :  { %s1978_s13 = ssub.f32 %s1659_s25, %s1665_s21  ;;  %v686_v14 = vadd.f32 %v685_v51, %v683_v6  ;;  %v668_v21 = vadd.f32 %v667_v4, %v665_v11 }
 0x11f   :  { %s1800_s0 = sld [smem:[#allocation9 + $0x10]] }
 0x120   :  { %v708_v8 = vstv %s1978_s13  ;;  %s1979_s29 = sld [smem:[#allocation24_spill]]  ;;  %v689_v18 = vadd.f32 %v688_v52, %v686_v14 }
 0x121   :  { %s1980_s3 = ssub.f32 %s1683_s18, %s1687_s15  ;;  %v709_v53 = vmul.f32 %v708_v8, %v439_v31 }
 0x122   :  { %s1806_s20 = sld [smem:[#allocation9 + $0x13]]  ;;  %v693_v33 = vstv %s1977_s26  ;;  %v692_v31 = vadd.f32 %v691_v55, %v689_v18 }
 0x123   :  { %v711_v60 = vstv %s1980_s3  ;;  %s1812_s25 = sld [smem:[#allocation9 + $0x12]]  ;;  %v710_v23 = vadd.f32 %v709_v53, %v707_v50  ;;  %v694_v3 = vmul.f32 %v693_v33, %v1397_v0  ;;  %v669_v0 = vmul.f32 0.2, %v668_v21 }
 0x124   :  { %v712_v58 = vmul.f32 %v711_v60, %v472_v15  ;;  %s257_s21 = ssub.f32 %s1756_s5, %s1760_s12  ;;  %v720_v15 = vstv %s254_s28 }
 0x125   :  { %s260_s18 = ssub.f32 %s1776_s22, %s1780_s14  ;;  %v695_v9 = vadd.f32 %v694_v3, %v692_v31  ;;  %v721_v34 = vmul.f32 %v720_v15, %v571_v43  ;;  %v670_v27 = vmax.f32 %v668_v21, %v669_v0 }
 0x126   :  { %v696_v22 = vstv %s1979_s29  ;;  %v713_v30 = vadd.f32 %v712_v58, %v710_v23  ;;  %s263_s8 = ssub.f32 %s1791_s9, %s1800_s0  ;;  %v723_v19 = vstv %s257_s21 }
 0x127   :  { %v697_v38 = vmul.f32 %v696_v22, %v1421_v17  ;;  %v726_v35 = vstv %s260_s18  ;;  %v724_v28 = vmul.f32 %v723_v19, %v604_v44  ;;  %s1983_s30 = sld [smem:[#allocation55_spill]] }
 0x128   :  { %v716_v46 = vadd.f32 %v715_v57, %v713_v30  ;;  %v729_v10 = vstv %s263_s8  ;;  %v727_v37 = vmul.f32 %v726_v35, %v637_v47 }
 0x129   :  { %v698_v32 = vadd.f32 %v697_v38, %v695_v9  ;;  %s266_s15 = ssub.f32 %s1806_s20, %s1812_s25  ;;  %v730_v41 = vmul.f32 %v729_v10, %v670_v27 }
 0x12a   :  { %v719_v39 = vadd.f32 %v718_v26, %v716_v46 }
 0x12b   :  { %v701_v17 = vadd.f32 %v700_v63, %v698_v32  ;;  %v732_v48 = vstv %s266_s15 }
 0x12c   :  { %v722_v42 = vadd.f32 %v721_v34, %v719_v39 }
 0x12d   :  { %v702_v45 = vmul.f32 0.2, %v701_v17 }
 0x12e   :  { %v725_v49 = vadd.f32 %v724_v28, %v722_v42 }
 0x12f   :  { %v703_v25 = vmax.f32 %v701_v17, %v702_v45 }
 0x130   :  { %v728_v16 = vadd.f32 %v727_v37, %v725_v49 }
 0x131   :  { %v733_v56 = vmul.f32 %v732_v48, %v703_v25 }
 0x132   :  { %v731_v36 = vadd.f32 %v730_v41, %v728_v16 }
 0x134   :  { %v734_v59 = vadd.f32 %v733_v56, %v731_v36 }
 0x136   :  { %v735_v62 = vmul.f32 1.442695, %v734_v59 }
 0x138   :  { %939 = vpow2.f32 %v735_v62 }
 0x13e   :  { %v940_v1 = vpop.eup %939 }
 0x13f   :  { %v737_v40 = vadd.f32 1.0, %v940_v1 }
 0x141   :  { %941 = vrcp.f32 %v737_v40  ;;  %v749_v54 = vand.u32 2147483648, %v737_v40  ;;  %v747_v7 = vand.u32 2147483647, %v737_v40  ;;  %vm743_vm2 = vweird.f32 %v737_v40 }
 0x143   :  { %v750_v11 = vor.u32 1.1754944e-38, %v749_v54  ;;  %vm748_vm4 = vcmp.eq.f32.partialorder %v747_v7, 8.507059e+37 }
 0x147   :  { %v942_v4 = vpop.eup %941 }
 0x148   :  { %v739_v6 = vmul.f32 %v942_v4, %v737_v40  ;;  %vm744_vm1 = vweird.f32 %v942_v4 }
 0x149   :  { %vm745_vm3 = vmor %vm743_vm2, %vm744_vm1 }
 0x14a   :  { %v740_v51 = vsub.f32 1.0, %v739_v6 }
 0x14c   :  { %v741_v2 = vmul.f32 %v942_v4, %v740_v51 }
 0x14e   :  { %v742_v8 = vadd.f32 %v942_v4, %v741_v2 }
 0x150   :  { %v746_v14 = vsel %vm745_vm3, %v942_v4, %v742_v8 }
 0x151   :  { %v751_v52 = vsel %vm748_vm4, %v750_v11, %v746_v14 }
 0x152   :  { %v753_v60 = vsub.f32 1.0, %v751_v52 }
 0x154   :  { %754 = vrot.lane.b32.xlu1 %v753_v60, %s1981_s6 }
 0x15c   :  { %758 = vrot.lane.b32.xlu1 %v751_v52, %s1982_s16 }
 0x1c6   :  { %v755_v12 = vpop.permute.xlu1 %754 }
 0x1c7   :  { %v756_v33 = vsel %vm1235_vm0, %v751_v52, %v755_v12 }
 0x1c8   :  { %757 = vst [vmem:[%s1983_s30] sm:$0xff] %v756_v33 }
 0x1ce   :  { %v759_v50 = vpop.permute.xlu1 %758 }
 0x1cf   :  { %v760_v53 = vsel %vm1235_vm0, %v759_v50, %v753_v60 }
 0x1d0   :  { %930 = vst [vmem:[%s1983_s30 + $0x8] sm:$0xff] %v760_v53 }
 0x1d1   :  { %767 = vsyncpa [#allocation3], 1 }
 0x1d2   :  { %768 = vsyncpa [#allocation5], 1 }
 0x1d3   :  { %769 = vsyncpa [#allocation8], 1 }
 0x1d4   :  { %770 = vsyncpa [#allocation11], 1 }

</bundles_post_ra>
